<compile_context>
chip_gen: v5e
topology: v5e:2x2
jax: 0.10.0
libtpu: 0.0.40
codegen_flags: <defaults>
</compile_context>

<pallas_src>
import jax
import jax.numpy as jnp
from jax.experimental import pallas as pl
from jax.experimental.pallas import tpu as pltpu

EPS = 1e-5  # torch.nn.LayerNorm default


# ----------------------------------------------------------------------------- in-kernel helpers
def _layernorm(x, g, b):
    x = x.astype(jnp.float32)
    mean = jnp.mean(x, axis=-1, keepdims=True)
    var = jnp.mean(jnp.square(x - mean), axis=-1, keepdims=True)
    return (x - mean) * jax.lax.rsqrt(var + EPS) * g + b


def _recip(x):
    # EUP approximate reciprocal seed + one Newton-Raphson step: keeps the divide off the
    # VALU exact-division sequence while retaining ~f32 accuracy (error ~ seed_error^2).
    r = pl.reciprocal(x, approx=True)
    return r * (2.0 - x * r)


def _softmax_lastdim(x):
    m = jnp.max(x, axis=-1, keepdims=True)
    e = jnp.exp(x - m)
    s = jnp.sum(e, axis=-1, keepdims=True)
    return e * _recip(s)


def _erf(x):
    # Abramowitz & Stegun 7.1.26, |error| < 1.5e-7.  Uses only exp (EUP) + VPU ops, so it
    # lowers on every TPU generation (no dependence on a hardware/Mosaic erf primitive).
    ax = jnp.abs(x)
    t = _recip(1.0 + 0.3275911 * ax)
    poly = t * (0.254829592 + t * (-0.284496736 + t * (1.421413741
              + t * (-1.453152027 + t * 1.061405429))))
    y = 1.0 - poly * jnp.exp(-ax * ax)
    return jnp.where(x >= 0.0, y, -y)


def _gelu_exact(x):
    # matches torch.nn.GELU() (erf form) to ~1e-7
    return 0.5 * x * (1.0 + _erf(x * 0.7071067811865476))


# ----------------------------------------------------------------------------- fused kernel
def _make_fused_kernel(*, depth, merger_cfg, heads, dim_head):
    """Build the fused per-batch-element forward kernel.

    Kernel ref order:
      x, then per layer: [attn g, attn b, wq_h, wk_h, wv_h, wout_h,
                          ff g, ff b, w1, b1, w2, b2]  (12 refs / layer),
      then per patch-merger (sorted by layer index): [g, b, queries],
      then final LN [g, b], then the output ref.
    """
    merger_layers = [idx for idx, _ in merger_cfg]
    attn_scale = dim_head ** -0.5

    def kernel(*refs):
        it = iter(refs)
        x_ref = next(it)
        layer_refs = [tuple(next(it) for _ in range(12)) for _ in range(depth)]
        merger_refs = {idx: tuple(next(it) for _ in range(3)) for idx in merger_layers}
        lng_ref = next(it)
        lnb_ref = next(it)
        o_ref = next(it)

        x = x_ref[0].astype(jnp.float32)  # (n, D) tokens of this batch element

        for li in range(depth):
            (ag, ab, wq, wk, wv, wo, fg, fb, w1, b1, w2, b2) = layer_refs[li]
            n_cur, d_model = x.shape

            # ------------------ attention (pre-LN, residual) ------------------
            xn = _layernorm(x, ag[...], ab[...])                        # (n, D)
            xh = jnp.broadcast_to(xn, (heads, n_cur, d_model))          # (H, n, D)
            q = jnp.einsum("hnd,hde->hne", xh, wq[...],
                           preferred_element_type=jnp.float32)          # (H, n, dh)
            k = jnp.einsum("hnd,hde->hne", xh, wk[...],
                           preferred_element_type=jnp.float32)
            v = jnp.einsum("hnd,hde->hne", xh, wv[...],
                           preferred_element_type=jnp.float32)
            dots = jnp.einsum("hne,hme->hnm", q, k,
                              preferred_element_type=jnp.float32) * attn_scale
            attn = _softmax_lastdim(dots)                               # (H, n, n)
            out = jnp.einsum("hnm,hme->hne", attn, v,
                             preferred_element_type=jnp.float32)        # (H, n, dh)
            proj = jnp.einsum("hne,heD->hnD", out, wo[...],
                              preferred_element_type=jnp.float32)       # (H, n, D)
            # Static accumulation over the (tiny) head axis: leading-dim indexing +
            # vreg adds only — no 8-lane slicing or lane concatenation.
            y = proj[0]
            for h in range(1, heads):
                y = y + proj[h]
            x = x + y                                                   # residual

            # ------------------ feed-forward (pre-LN, residual) ------------------
            xn = _layernorm(x, fg[...], fb[...])
            hmid = jnp.dot(xn, w1[...], preferred_element_type=jnp.float32) + b1[...]
            hmid = _gelu_exact(hmid)          # erf-form GELU == torch.nn.GELU()
            y = jnp.dot(hmid, w2[...], preferred_element_type=jnp.float32) + b2[...]
            x = x + y                                                   # residual

            # ------------------ optional patch merger after this layer ------------------
            if li in merger_refs:
                mg, mb, qs = merger_refs[li]
                pm_scale = d_model ** -0.5
                xn = _layernorm(x, mg[...], mb[...])                    # (n, D)
                sim = jnp.einsum("md,nd->mn", qs[...], xn,
                                 preferred_element_type=jnp.float32) * pm_scale
                attn = _softmax_lastdim(sim)                            # (M, n)
                # no residual after merging (matches the PyTorch module)
                x = jnp.dot(attn, xn, preferred_element_type=jnp.float32)  # (M, D)

        xo = _layernorm(x, lng_ref[...], lnb_ref[...])
        o_ref[0] = xo.astype(o_ref.dtype)

    return kernel


# ----------------------------------------------------------------------------- wrapper
def transformer_patchmerger_forward(x, params, *, heads, dim_head):
    B, N, D = x.shape
    depth = len(params["layers"])
    merger_cfg = tuple(sorted((int(idx), int(p["queries"].shape[0]))
                              for idx, p in params["patch_mergers"].items()
                              if 0 <= int(idx) < depth))
    n_final = merger_cfg[-1][1] if merger_cfg else N

    inputs = [x]
    in_specs = [pl.BlockSpec((1, N, D), lambda b: (b, 0, 0))]

    def add(arr):
        nd = arr.ndim
        inputs.append(arr)
        # Full-array block, constant index across the batch grid: fetched once, kept
        # resident (no re-DMA when the block index does not change).
        in_specs.append(pl.BlockSpec(arr.shape, lambda b, _nd=nd: (0,) * _nd))

    for attn_p, ff_p in params["layers"]:
        wq, wk, wv = jnp.split(attn_p["wqkv"], 3, axis=1)  # each (D, heads*dh)

        def per_head(w):  # (D, heads*dh) -> (heads, D, dh)   (plain XLA, outside kernel)
            return jnp.transpose(w.reshape(D, heads, dim_head), (1, 0, 2))

        add(attn_p["g"]); add(attn_p["b"])
        add(per_head(wq)); add(per_head(wk)); add(per_head(wv))
        add(attn_p["wout"].reshape(heads, dim_head, D))     # (heads, dh, D)
        add(ff_p["g"]); add(ff_p["b"])
        add(ff_p["w1"]); add(ff_p["b1"]); add(ff_p["w2"]); add(ff_p["b2"])

    for idx, _ in merger_cfg:
        pm = params["patch_mergers"][idx]
        add(pm["g"]); add(pm["b"]); add(pm["queries"])

    lg, lb = params["final_ln"]
    add(lg); add(lb)

    kernel = _make_fused_kernel(depth=depth, merger_cfg=merger_cfg,
                                heads=heads, dim_head=dim_head)

    return pl.pallas_call(
        kernel,
        out_shape=jax.ShapeDtypeStruct((B, n_final, D), x.dtype),
        grid=(B,),
        in_specs=in_specs,
        out_specs=pl.BlockSpec((1, n_final, D), lambda b: (b, 0, 0)),
        compiler_params=pltpu.CompilerParams(dimension_semantics=("parallel",)),
    )(*inputs)


# ----------------------------------------------------------------------------- params
def init_params(key, *, dim, depth, heads, dim_head, mlp_dim, patch_merge_layers):
    inner = heads * dim_head
    params = {"layers": [], "patch_mergers": {}, "final_ln": None}
    keys = jax.random.split(key, depth * 4 + len(patch_merge_layers) + 1)
    ki = 0
    for _ in range(depth):
        attn = dict(
            g=jnp.ones((1, dim), jnp.float32),
            b=jnp.zeros((1, dim), jnp.float32),
            wqkv=0.05 * jax.random.normal(keys[ki], (dim, 3 * inner), jnp.float32),
            wout=0.05 * jax.random.normal(keys[ki + 1], (inner, dim), jnp.float32),
        )
        ff = dict(
            g=jnp.ones((1, dim), jnp.float32),
            b=jnp.zeros((1, dim), jnp.float32),
            w1=0.05 * jax.random.normal(keys[ki + 2], (dim, mlp_dim), jnp.float32),
            b1=jnp.zeros((1, mlp_dim), jnp.float32),
            w2=0.05 * jax.random.normal(keys[ki + 3], (mlp_dim, dim), jnp.float32),
            b2=jnp.zeros((1, dim), jnp.float32),
        )
        ki += 4
        params["layers"].append((attn, ff))
    for layer_index, num_tokens_out in patch_merge_layers:
        params["patch_mergers"][layer_index] = dict(
            g=jnp.ones((1, dim), jnp.float32),
            b=jnp.zeros((1, dim), jnp.float32),
            queries=jax.random.normal(keys[ki], (num_tokens_out, dim), jnp.float32),
        )
        ki += 1
    params["final_ln"] = (jnp.ones((1, dim), jnp.float32), jnp.zeros((1, dim), jnp.float32))
    return params


# ----------------------------------------------------------------------------- pure-JAX reference
def _reference(x, params, *, heads, dim_head):
    def ln(x, g, b):
        m = x.mean(-1, keepdims=True)
        v = ((x - m) ** 2).mean(-1, keepdims=True)
        return (x - m) / jnp.sqrt(v + EPS) * g + b

    for index, (ap, fp) in enumerate(params["layers"]):
        xn = ln(x, ap["g"], ap["b"])
        qkv = xn @ ap["wqkv"]
        inner = heads * dim_head
        q, k, v = jnp.split(qkv, 3, axis=-1)

        def split_heads(t):
            B, N, _ = t.shape
            return t.reshape(B, N, heads, dim_head).transpose(0, 2, 1, 3)

        q, k, v = map(split_heads, (q, k, v))
        dots = jnp.einsum("bhnd,bhmd->bhnm", q, k) * dim_head ** -0.5
        attn = jax.nn.softmax(dots, axis=-1)
        out = jnp.einsum("bhnm,bhmd->bhnd", attn, v)
        out = out.transpose(0, 2, 1, 3).reshape(x.shape[0], x.shape[1], inner)
        x = out @ ap["wout"] + x
        xn = ln(x, fp["g"], fp["b"])
        h = jax.nn.gelu(xn @ fp["w1"] + fp["b1"], approximate=False)
        x = h @ fp["w2"] + fp["b2"] + x
        if index in params["patch_mergers"]:
            pm = params["patch_mergers"][index]
            xn = ln(x, pm["g"], pm["b"])
            sim = jnp.einsum("md,bnd->bmn", pm["queries"], xn) * x.shape[-1] ** -0.5
            x = jax.nn.softmax(sim, axis=-1) @ xn
    g, b = params["final_ln"]
    return ln(x, g, b)


# ----------------------------------------------------------------------------- main
if __name__ == "__main__":
    dim, depth, heads, dim_head, mlp_dim = 32, 2, 2, 8, 64
    patch_merge_layers = [(0, 8)]  # after layer 0, merge to 8 tokens
    batch, n = 2, 16

    key = jax.random.PRNGKey(0)
    k_x, k_p = jax.random.split(key)
    x = jax.random.normal(k_x, (batch, n, dim), jnp.float32)
    params = init_params(k_p, dim=dim, depth=depth, heads=heads, dim_head=dim_head,
                         mlp_dim=mlp_dim, patch_merge_layers=patch_merge_layers)

    out = transformer_patchmerger_forward(x, params, heads=heads, dim_head=dim_head)
    out = jax.block_until_ready(out)

    ref = _reference(x, params, heads=heads, dim_head=dim_head)
    assert out.shape == (batch, patch_merge_layers[0][1], dim), out.shape
    # Tolerance 1e-3: the softmax uses the EUP approx reciprocal + one Newton step
    # (~6e-8 rel) and GELU uses the A&S erf polynomial (|err| < 1.5e-7); both are far
    # inside this bound but not bit-exact against the XLA reference.
    assert jnp.allclose(out, ref, atol=1e-3, rtol=1e-3), float(jnp.abs(out - ref).max())

    print("KERNEL_OK")
</pallas_src>

<mosaic_0001>
module attributes {stable_mosaic.version = 11 : i64} {
  func.func @kernel(%arg0: i32, %arg1: memref<1x16x32xf32, #tpu.memory_space<vmem>>, %arg2: memref<1x32xf32, #tpu.memory_space<vmem>>, %arg3: memref<1x32xf32, #tpu.memory_space<vmem>>, %arg4: memref<2x32x8xf32, #tpu.memory_space<vmem>>, %arg5: memref<2x32x8xf32, #tpu.memory_space<vmem>>, %arg6: memref<2x32x8xf32, #tpu.memory_space<vmem>>, %arg7: memref<2x8x32xf32, #tpu.memory_space<vmem>>, %arg8: memref<1x32xf32, #tpu.memory_space<vmem>>, %arg9: memref<1x32xf32, #tpu.memory_space<vmem>>, %arg10: memref<32x64xf32, #tpu.memory_space<vmem>>, %arg11: memref<1x64xf32, #tpu.memory_space<vmem>>, %arg12: memref<64x32xf32, #tpu.memory_space<vmem>>, %arg13: memref<1x32xf32, #tpu.memory_space<vmem>>, %arg14: memref<1x32xf32, #tpu.memory_space<vmem>>, %arg15: memref<1x32xf32, #tpu.memory_space<vmem>>, %arg16: memref<2x32x8xf32, #tpu.memory_space<vmem>>, %arg17: memref<2x32x8xf32, #tpu.memory_space<vmem>>, %arg18: memref<2x32x8xf32, #tpu.memory_space<vmem>>, %arg19: memref<2x8x32xf32, #tpu.memory_space<vmem>>, %arg20: memref<1x32xf32, #tpu.memory_space<vmem>>, %arg21: memref<1x32xf32, #tpu.memory_space<vmem>>, %arg22: memref<32x64xf32, #tpu.memory_space<vmem>>, %arg23: memref<1x64xf32, #tpu.memory_space<vmem>>, %arg24: memref<64x32xf32, #tpu.memory_space<vmem>>, %arg25: memref<1x32xf32, #tpu.memory_space<vmem>>, %arg26: memref<1x32xf32, #tpu.memory_space<vmem>>, %arg27: memref<1x32xf32, #tpu.memory_space<vmem>>, %arg28: memref<8x32xf32, #tpu.memory_space<vmem>>, %arg29: memref<1x32xf32, #tpu.memory_space<vmem>>, %arg30: memref<1x32xf32, #tpu.memory_space<vmem>>, %arg31: memref<1x8x32xf32, #tpu.memory_space<vmem>>) attributes {dimension_semantics = [#tpu.dimension_semantics<parallel>], iteration_bounds = array<i64: 2>, scalar_prefetch = 0 : i64, scratch_operands = 0 : i64, tpu.core_type = #tpu.core_type<tc>, window_params = [{transform_indices = @transform_0, window_bounds = array<i64: 1, 16, 32>}, {pipeline_mode = #tpu.pipeline_mode<synchronous>, transform_indices = @transform_1, window_bounds = array<i64: 1, 32>}, {pipeline_mode = #tpu.pipeline_mode<synchronous>, transform_indices = @transform_2, window_bounds = array<i64: 1, 32>}, {pipeline_mode = #tpu.pipeline_mode<synchronous>, transform_indices = @transform_3, window_bounds = array<i64: 2, 32, 8>}, {pipeline_mode = #tpu.pipeline_mode<synchronous>, transform_indices = @transform_4, window_bounds = array<i64: 2, 32, 8>}, {pipeline_mode = #tpu.pipeline_mode<synchronous>, transform_indices = @transform_5, window_bounds = array<i64: 2, 32, 8>}, {pipeline_mode = #tpu.pipeline_mode<synchronous>, transform_indices = @transform_6, window_bounds = array<i64: 2, 8, 32>}, {pipeline_mode = #tpu.pipeline_mode<synchronous>, transform_indices = @transform_7, window_bounds = array<i64: 1, 32>}, {pipeline_mode = #tpu.pipeline_mode<synchronous>, transform_indices = @transform_8, window_bounds = array<i64: 1, 32>}, {pipeline_mode = #tpu.pipeline_mode<synchronous>, transform_indices = @transform_9, window_bounds = array<i64: 32, 64>}, {pipeline_mode = #tpu.pipeline_mode<synchronous>, transform_indices = @transform_10, window_bounds = array<i64: 1, 64>}, {pipeline_mode = #tpu.pipeline_mode<synchronous>, transform_indices = @transform_11, window_bounds = array<i64: 64, 32>}, {pipeline_mode = #tpu.pipeline_mode<synchronous>, transform_indices = @transform_12, window_bounds = array<i64: 1, 32>}, {pipeline_mode = #tpu.pipeline_mode<synchronous>, transform_indices = @transform_13, window_bounds = array<i64: 1, 32>}, {pipeline_mode = #tpu.pipeline_mode<synchronous>, transform_indices = @transform_14, window_bounds = array<i64: 1, 32>}, {pipeline_mode = #tpu.pipeline_mode<synchronous>, transform_indices = @transform_15, window_bounds = array<i64: 2, 32, 8>}, {pipeline_mode = #tpu.pipeline_mode<synchronous>, transform_indices = @transform_16, window_bounds = array<i64: 2, 32, 8>}, {pipeline_mode = #tpu.pipeline_mode<synchronous>, transform_indices = @transform_17, window_bounds = array<i64: 2, 32, 8>}, {pipeline_mode = #tpu.pipeline_mode<synchronous>, transform_indices = @transform_18, window_bounds = array<i64: 2, 8, 32>}, {pipeline_mode = #tpu.pipeline_mode<synchronous>, transform_indices = @transform_19, window_bounds = array<i64: 1, 32>}, {pipeline_mode = #tpu.pipeline_mode<synchronous>, transform_indices = @transform_20, window_bounds = array<i64: 1, 32>}, {pipeline_mode = #tpu.pipeline_mode<synchronous>, transform_indices = @transform_21, window_bounds = array<i64: 32, 64>}, {pipeline_mode = #tpu.pipeline_mode<synchronous>, transform_indices = @transform_22, window_bounds = array<i64: 1, 64>}, {pipeline_mode = #tpu.pipeline_mode<synchronous>, transform_indices = @transform_23, window_bounds = array<i64: 64, 32>}, {pipeline_mode = #tpu.pipeline_mode<synchronous>, transform_indices = @transform_24, window_bounds = array<i64: 1, 32>}, {pipeline_mode = #tpu.pipeline_mode<synchronous>, transform_indices = @transform_25, window_bounds = array<i64: 1, 32>}, {pipeline_mode = #tpu.pipeline_mode<synchronous>, transform_indices = @transform_26, window_bounds = array<i64: 1, 32>}, {pipeline_mode = #tpu.pipeline_mode<synchronous>, transform_indices = @transform_27, window_bounds = array<i64: 8, 32>}, {pipeline_mode = #tpu.pipeline_mode<synchronous>, transform_indices = @transform_28, window_bounds = array<i64: 1, 32>}, {pipeline_mode = #tpu.pipeline_mode<synchronous>, transform_indices = @transform_29, window_bounds = array<i64: 1, 32>}, {transform_indices = @transform_30, window_bounds = array<i64: 1, 8, 32>}]} {
    %c0 = arith.constant 0 : index
    %c0_0 = arith.constant 0 : index
    %c0_1 = arith.constant 0 : index
    %0 = vector.load %arg1[%c0, %c0_0, %c0_1] : memref<1x16x32xf32, #tpu.memory_space<vmem>>, vector<1x16x32xf32>
    %1 = vector.shape_cast %0 : vector<1x16x32xf32> to vector<16x32xf32>
    %c0_2 = arith.constant 0 : index
    %c0_3 = arith.constant 0 : index
    %2 = vector.load %arg2[%c0_2, %c0_3] : memref<1x32xf32, #tpu.memory_space<vmem>>, vector<1x32xf32>
    %c0_4 = arith.constant 0 : index
    %c0_5 = arith.constant 0 : index
    %3 = vector.load %arg3[%c0_4, %c0_5] : memref<1x32xf32, #tpu.memory_space<vmem>>, vector<1x32xf32>
    %cst = arith.constant dense<0.000000e+00> : vector<16xf32>
    %4 = vector.multi_reduction <add>, %1, %cst [1] : vector<16x32xf32> to vector<16xf32>
    %5 = vector.shape_cast %4 : vector<16xf32> to vector<16x1xf32>
    %cst_6 = arith.constant 3.200000e+01 : f32
    %6 = vector.broadcast %cst_6 : f32 to vector<16x1xf32>
    %7 = arith.divf %5, %6 : vector<16x1xf32>
    %8 = vector.broadcast %7 : vector<16x1xf32> to vector<16x32xf32>
    %9 = arith.subf %1, %8 : vector<16x32xf32>
    %10 = arith.mulf %9, %9 : vector<16x32xf32>
    %cst_7 = arith.constant dense<0.000000e+00> : vector<16xf32>
    %11 = vector.multi_reduction <add>, %10, %cst_7 [1] : vector<16x32xf32> to vector<16xf32>
    %12 = vector.shape_cast %11 : vector<16xf32> to vector<16x1xf32>
    %cst_8 = arith.constant 3.200000e+01 : f32
    %13 = vector.broadcast %cst_8 : f32 to vector<16x1xf32>
    %14 = arith.divf %12, %13 : vector<16x1xf32>
    %15 = vector.broadcast %7 : vector<16x1xf32> to vector<16x32xf32>
    %16 = arith.subf %1, %15 : vector<16x32xf32>
    %cst_9 = arith.constant 9.99999974E-6 : f32
    %17 = vector.broadcast %cst_9 : f32 to vector<16x1xf32>
    %18 = arith.addf %14, %17 : vector<16x1xf32>
    %19 = math.rsqrt %18 : vector<16x1xf32>
    %20 = vector.broadcast %19 : vector<16x1xf32> to vector<16x32xf32>
    %21 = arith.mulf %16, %20 : vector<16x32xf32>
    %22 = vector.broadcast %2 : vector<1x32xf32> to vector<16x32xf32>
    %23 = arith.mulf %21, %22 : vector<16x32xf32>
    %24 = vector.broadcast %3 : vector<1x32xf32> to vector<16x32xf32>
    %25 = arith.addf %23, %24 : vector<16x32xf32>
    %26 = vector.shape_cast %25 : vector<16x32xf32> to vector<1x16x32xf32>
    %27 = vector.broadcast %26 : vector<1x16x32xf32> to vector<2x16x32xf32>
    %c0_10 = arith.constant 0 : index
    %c0_11 = arith.constant 0 : index
    %c0_12 = arith.constant 0 : index
    %28 = vector.load %arg4[%c0_10, %c0_11, %c0_12] : memref<2x32x8xf32, #tpu.memory_space<vmem>>, vector<2x32x8xf32>
    "tpu.trace_start"() <{level = 10 : i32, message = "hnd,hde->hne"}> : () -> ()
    %cst_13 = arith.constant dense<0.000000e+00> : vector<2x16x8xf32>
    %29 = tpu.matmul %27, %28, %cst_13 {dimension_numbers = #tpu.dot_dimension_numbers<[2], [1], [1], [2], [0, 0, 0, 1, 1, 2], [0], [0]>} : vector<2x16x32xf32>, vector<2x32x8xf32>, vector<2x16x8xf32> -> vector<2x16x8xf32>
    "tpu.trace_stop"() : () -> ()
    %c0_14 = arith.constant 0 : index
    %c0_15 = arith.constant 0 : index
    %c0_16 = arith.constant 0 : index
    %30 = vector.load %arg5[%c0_14, %c0_15, %c0_16] : memref<2x32x8xf32, #tpu.memory_space<vmem>>, vector<2x32x8xf32>
    "tpu.trace_start"() <{level = 10 : i32, message = "hnd,hde->hne"}> : () -> ()
    %cst_17 = arith.constant dense<0.000000e+00> : vector<2x16x8xf32>
    %31 = tpu.matmul %27, %30, %cst_17 {dimension_numbers = #tpu.dot_dimension_numbers<[2], [1], [1], [2], [0, 0, 0, 1, 1, 2], [0], [0]>} : vector<2x16x32xf32>, vector<2x32x8xf32>, vector<2x16x8xf32> -> vector<2x16x8xf32>
    "tpu.trace_stop"() : () -> ()
    %c0_18 = arith.constant 0 : index
    %c0_19 = arith.constant 0 : index
    %c0_20 = arith.constant 0 : index
    %32 = vector.load %arg6[%c0_18, %c0_19, %c0_20] : memref<2x32x8xf32, #tpu.memory_space<vmem>>, vector<2x32x8xf32>
    "tpu.trace_start"() <{level = 10 : i32, message = "hnd,hde->hne"}> : () -> ()
    %cst_21 = arith.constant dense<0.000000e+00> : vector<2x16x8xf32>
    %33 = tpu.matmul %27, %32, %cst_21 {dimension_numbers = #tpu.dot_dimension_numbers<[2], [1], [1], [2], [0, 0, 0, 1, 1, 2], [0], [0]>} : vector<2x16x32xf32>, vector<2x32x8xf32>, vector<2x16x8xf32> -> vector<2x16x8xf32>
    "tpu.trace_stop"() : () -> ()
    "tpu.trace_start"() <{level = 10 : i32, message = "hne,hme->hnm"}> : () -> ()
    %cst_22 = arith.constant dense<0.000000e+00> : vector<2x16x16xf32>
    %34 = tpu.matmul %29, %31, %cst_22 {dimension_numbers = #tpu.dot_dimension_numbers<[2], [2], [1], [1], [0, 0, 0, 1, 1, 1], [0], [0]>} : vector<2x16x8xf32>, vector<2x16x8xf32>, vector<2x16x16xf32> -> vector<2x16x16xf32>
    "tpu.trace_stop"() : () -> ()
    %cst_23 = arith.constant 0.353553385 : f32
    %35 = vector.broadcast %cst_23 : f32 to vector<2x16x16xf32>
    %36 = arith.mulf %34, %35 : vector<2x16x16xf32>
    %cst_24 = arith.constant dense<0xFF800000> : vector<2x16xf32>
    %37 = vector.multi_reduction <maximumf>, %36, %cst_24 [2] : vector<2x16x16xf32> to vector<2x16xf32>
    %38 = vector.shape_cast %37 : vector<2x16xf32> to vector<2x16x1xf32>
    %39 = vector.broadcast %38 : vector<2x16x1xf32> to vector<2x16x16xf32>
    %40 = arith.subf %36, %39 : vector<2x16x16xf32>
    %41 = math.exp %40 : vector<2x16x16xf32>
    %cst_25 = arith.constant dense<0.000000e+00> : vector<2x16xf32>
    %42 = vector.multi_reduction <add>, %41, %cst_25 [2] : vector<2x16x16xf32> to vector<2x16xf32>
    %43 = vector.shape_cast %42 : vector<2x16xf32> to vector<2x16x1xf32>
    %44 = tpu.reciprocal %43 {approx = true} : vector<2x16x1xf32> -> vector<2x16x1xf32>
    %45 = arith.mulf %43, %44 : vector<2x16x1xf32>
    %cst_26 = arith.constant 2.000000e+00 : f32
    %46 = vector.broadcast %cst_26 : f32 to vector<2x16x1xf32>
    %47 = arith.subf %46, %45 : vector<2x16x1xf32>
    %48 = arith.mulf %44, %47 : vector<2x16x1xf32>
    %49 = vector.broadcast %48 : vector<2x16x1xf32> to vector<2x16x16xf32>
    %50 = arith.mulf %41, %49 : vector<2x16x16xf32>
    "tpu.trace_start"() <{level = 10 : i32, message = "hnm,hme->hne"}> : () -> ()
    %cst_27 = arith.constant dense<0.000000e+00> : vector<2x16x8xf32>
    %51 = tpu.matmul %50, %33, %cst_27 {dimension_numbers = #tpu.dot_dimension_numbers<[2], [1], [1], [2], [0, 0, 0, 1, 1, 2], [0], [0]>} : vector<2x16x16xf32>, vector<2x16x8xf32>, vector<2x16x8xf32> -> vector<2x16x8xf32>
    "tpu.trace_stop"() : () -> ()
    %c0_28 = arith.constant 0 : index
    %c0_29 = arith.constant 0 : index
    %c0_30 = arith.constant 0 : index
    %52 = vector.load %arg7[%c0_28, %c0_29, %c0_30] : memref<2x8x32xf32, #tpu.memory_space<vmem>>, vector<2x8x32xf32>
    "tpu.trace_start"() <{level = 10 : i32, message = "hne,heD->hnD"}> : () -> ()
    %cst_31 = arith.constant dense<0.000000e+00> : vector<2x16x32xf32>
    %53 = tpu.matmul %51, %52, %cst_31 {dimension_numbers = #tpu.dot_dimension_numbers<[2], [1], [1], [2], [0, 0, 0, 1, 1, 2], [0], [0]>} : vector<2x16x8xf32>, vector<2x8x32xf32>, vector<2x16x32xf32> -> vector<2x16x32xf32>
    "tpu.trace_stop"() : () -> ()
    %54 = vector.extract_strided_slice %53 {offsets = [0, 0, 0], sizes = [1, 16, 32], strides = [1, 1, 1]} : vector<2x16x32xf32> to vector<1x16x32xf32>
    %55 = vector.shape_cast %54 : vector<1x16x32xf32> to vector<16x32xf32>
    %56 = vector.extract_strided_slice %53 {offsets = [1, 0, 0], sizes = [1, 16, 32], strides = [1, 1, 1]} : vector<2x16x32xf32> to vector<1x16x32xf32>
    %57 = vector.shape_cast %56 : vector<1x16x32xf32> to vector<16x32xf32>
    %58 = arith.addf %55, %57 : vector<16x32xf32>
    %59 = arith.addf %1, %58 : vector<16x32xf32>
    %c0_32 = arith.constant 0 : index
    %c0_33 = arith.constant 0 : index
    %60 = vector.load %arg8[%c0_32, %c0_33] : memref<1x32xf32, #tpu.memory_space<vmem>>, vector<1x32xf32>
    %c0_34 = arith.constant 0 : index
    %c0_35 = arith.constant 0 : index
    %61 = vector.load %arg9[%c0_34, %c0_35] : memref<1x32xf32, #tpu.memory_space<vmem>>, vector<1x32xf32>
    %cst_36 = arith.constant dense<0.000000e+00> : vector<16xf32>
    %62 = vector.multi_reduction <add>, %59, %cst_36 [1] : vector<16x32xf32> to vector<16xf32>
    %63 = vector.shape_cast %62 : vector<16xf32> to vector<16x1xf32>
    %cst_37 = arith.constant 3.200000e+01 : f32
    %64 = vector.broadcast %cst_37 : f32 to vector<16x1xf32>
    %65 = arith.divf %63, %64 : vector<16x1xf32>
    %66 = vector.broadcast %65 : vector<16x1xf32> to vector<16x32xf32>
    %67 = arith.subf %59, %66 : vector<16x32xf32>
    %68 = arith.mulf %67, %67 : vector<16x32xf32>
    %cst_38 = arith.constant dense<0.000000e+00> : vector<16xf32>
    %69 = vector.multi_reduction <add>, %68, %cst_38 [1] : vector<16x32xf32> to vector<16xf32>
    %70 = vector.shape_cast %69 : vector<16xf32> to vector<16x1xf32>
    %cst_39 = arith.constant 3.200000e+01 : f32
    %71 = vector.broadcast %cst_39 : f32 to vector<16x1xf32>
    %72 = arith.divf %70, %71 : vector<16x1xf32>
    %73 = vector.broadcast %65 : vector<16x1xf32> to vector<16x32xf32>
    %74 = arith.subf %59, %73 : vector<16x32xf32>
    %cst_40 = arith.constant 9.99999974E-6 : f32
    %75 = vector.broadcast %cst_40 : f32 to vector<16x1xf32>
    %76 = arith.addf %72, %75 : vector<16x1xf32>
    %77 = math.rsqrt %76 : vector<16x1xf32>
    %78 = vector.broadcast %77 : vector<16x1xf32> to vector<16x32xf32>
    %79 = arith.mulf %74, %78 : vector<16x32xf32>
    %80 = vector.broadcast %60 : vector<1x32xf32> to vector<16x32xf32>
    %81 = arith.mulf %79, %80 : vector<16x32xf32>
    %82 = vector.broadcast %61 : vector<1x32xf32> to vector<16x32xf32>
    %83 = arith.addf %81, %82 : vector<16x32xf32>
    %c0_41 = arith.constant 0 : index
    %c0_42 = arith.constant 0 : index
    %84 = vector.load %arg10[%c0_41, %c0_42] : memref<32x64xf32, #tpu.memory_space<vmem>>, vector<32x64xf32>
    %cst_43 = arith.constant dense<0.000000e+00> : vector<16x64xf32>
    %85 = tpu.matmul %83, %84, %cst_43 {dimension_numbers = #tpu.dot_dimension_numbers<[1], [0], [0], [1], [0, 0, 1, 1], [], []>} : vector<16x32xf32>, vector<32x64xf32>, vector<16x64xf32> -> vector<16x64xf32>
    %c0_44 = arith.constant 0 : index
    %c0_45 = arith.constant 0 : index
    %86 = vector.load %arg11[%c0_44, %c0_45] : memref<1x64xf32, #tpu.memory_space<vmem>>, vector<1x64xf32>
    %87 = vector.broadcast %86 : vector<1x64xf32> to vector<16x64xf32>
    %88 = arith.addf %85, %87 : vector<16x64xf32>
    %cst_46 = arith.constant 5.000000e-01 : f32
    %89 = vector.broadcast %cst_46 : f32 to vector<16x64xf32>
    %90 = arith.mulf %89, %88 : vector<16x64xf32>
    %cst_47 = arith.constant 0.707106769 : f32
    %91 = vector.broadcast %cst_47 : f32 to vector<16x64xf32>
    %92 = arith.mulf %88, %91 : vector<16x64xf32>
    %93 = math.absf %92 : vector<16x64xf32>
    %cst_48 = arith.constant 0.327591091 : f32
    %94 = vector.broadcast %cst_48 : f32 to vector<16x64xf32>
    %95 = arith.mulf %94, %93 : vector<16x64xf32>
    %cst_49 = arith.constant 1.000000e+00 : f32
    %96 = vector.broadcast %cst_49 : f32 to vector<16x64xf32>
    %97 = arith.addf %96, %95 : vector<16x64xf32>
    %98 = tpu.reciprocal %97 {approx = true} : vector<16x64xf32> -> vector<16x64xf32>
    %99 = arith.mulf %97, %98 : vector<16x64xf32>
    %cst_50 = arith.constant 2.000000e+00 : f32
    %100 = vector.broadcast %cst_50 : f32 to vector<16x64xf32>
    %101 = arith.subf %100, %99 : vector<16x64xf32>
    %102 = arith.mulf %98, %101 : vector<16x64xf32>
    %cst_51 = arith.constant 1.06140542 : f32
    %103 = vector.broadcast %cst_51 : f32 to vector<16x64xf32>
    %104 = arith.mulf %102, %103 : vector<16x64xf32>
    %cst_52 = arith.constant -1.45315206 : f32
    %105 = vector.broadcast %cst_52 : f32 to vector<16x64xf32>
    %106 = arith.addf %105, %104 : vector<16x64xf32>
    %107 = arith.mulf %102, %106 : vector<16x64xf32>
    %cst_53 = arith.constant 1.42141378 : f32
    %108 = vector.broadcast %cst_53 : f32 to vector<16x64xf32>
    %109 = arith.addf %108, %107 : vector<16x64xf32>
    %110 = arith.mulf %102, %109 : vector<16x64xf32>
    %cst_54 = arith.constant -0.284496725 : f32
    %111 = vector.broadcast %cst_54 : f32 to vector<16x64xf32>
    %112 = arith.addf %111, %110 : vector<16x64xf32>
    %113 = arith.mulf %102, %112 : vector<16x64xf32>
    %cst_55 = arith.constant 0.254829586 : f32
    %114 = vector.broadcast %cst_55 : f32 to vector<16x64xf32>
    %115 = arith.addf %114, %113 : vector<16x64xf32>
    %116 = arith.mulf %102, %115 : vector<16x64xf32>
    %cst_56 = arith.constant 0.000000e+00 : f32
    %117 = vector.broadcast %cst_56 : f32 to vector<16x64xf32>
    %118 = arith.subf %117, %93 : vector<16x64xf32>
    %119 = arith.mulf %118, %93 : vector<16x64xf32>
    %120 = math.exp %119 : vector<16x64xf32>
    %121 = arith.mulf %116, %120 : vector<16x64xf32>
    %cst_57 = arith.constant 1.000000e+00 : f32
    %122 = vector.broadcast %cst_57 : f32 to vector<16x64xf32>
    %123 = arith.subf %122, %121 : vector<16x64xf32>
    %cst_58 = arith.constant 0.000000e+00 : f32
    %124 = vector.broadcast %cst_58 : f32 to vector<16x64xf32>
    %125 = arith.cmpf oge, %92, %124 : vector<16x64xf32>
    %cst_59 = arith.constant 0.000000e+00 : f32
    %126 = vector.broadcast %cst_59 : f32 to vector<16x64xf32>
    %127 = arith.subf %126, %123 : vector<16x64xf32>
    %128 = arith.select %125, %123, %127 : vector<16x64xi1>, vector<16x64xf32>
    %cst_60 = arith.constant 1.000000e+00 : f32
    %129 = vector.broadcast %cst_60 : f32 to vector<16x64xf32>
    %130 = arith.addf %129, %128 : vector<16x64xf32>
    %131 = arith.mulf %90, %130 : vector<16x64xf32>
    %c0_61 = arith.constant 0 : index
    %c0_62 = arith.constant 0 : index
    %132 = vector.load %arg12[%c0_61, %c0_62] : memref<64x32xf32, #tpu.memory_space<vmem>>, vector<64x32xf32>
    %cst_63 = arith.constant dense<0.000000e+00> : vector<16x32xf32>
    %133 = tpu.matmul %131, %132, %cst_63 {dimension_numbers = #tpu.dot_dimension_numbers<[1], [0], [0], [1], [0, 0, 1, 1], [], []>} : vector<16x64xf32>, vector<64x32xf32>, vector<16x32xf32> -> vector<16x32xf32>
    %c0_64 = arith.constant 0 : index
    %c0_65 = arith.constant 0 : index
    %134 = vector.load %arg13[%c0_64, %c0_65] : memref<1x32xf32, #tpu.memory_space<vmem>>, vector<1x32xf32>
    %135 = vector.broadcast %134 : vector<1x32xf32> to vector<16x32xf32>
    %136 = arith.addf %133, %135 : vector<16x32xf32>
    %137 = arith.addf %59, %136 : vector<16x32xf32>
    %c0_66 = arith.constant 0 : index
    %c0_67 = arith.constant 0 : index
    %138 = vector.load %arg26[%c0_66, %c0_67] : memref<1x32xf32, #tpu.memory_space<vmem>>, vector<1x32xf32>
    %c0_68 = arith.constant 0 : index
    %c0_69 = arith.constant 0 : index
    %139 = vector.load %arg27[%c0_68, %c0_69] : memref<1x32xf32, #tpu.memory_space<vmem>>, vector<1x32xf32>
    %cst_70 = arith.constant dense<0.000000e+00> : vector<16xf32>
    %140 = vector.multi_reduction <add>, %137, %cst_70 [1] : vector<16x32xf32> to vector<16xf32>
    %141 = vector.shape_cast %140 : vector<16xf32> to vector<16x1xf32>
    %cst_71 = arith.constant 3.200000e+01 : f32
    %142 = vector.broadcast %cst_71 : f32 to vector<16x1xf32>
    %143 = arith.divf %141, %142 : vector<16x1xf32>
    %144 = vector.broadcast %143 : vector<16x1xf32> to vector<16x32xf32>
    %145 = arith.subf %137, %144 : vector<16x32xf32>
    %146 = arith.mulf %145, %145 : vector<16x32xf32>
    %cst_72 = arith.constant dense<0.000000e+00> : vector<16xf32>
    %147 = vector.multi_reduction <add>, %146, %cst_72 [1] : vector<16x32xf32> to vector<16xf32>
    %148 = vector.shape_cast %147 : vector<16xf32> to vector<16x1xf32>
    %cst_73 = arith.constant 3.200000e+01 : f32
    %149 = vector.broadcast %cst_73 : f32 to vector<16x1xf32>
    %150 = arith.divf %148, %149 : vector<16x1xf32>
    %151 = vector.broadcast %143 : vector<16x1xf32> to vector<16x32xf32>
    %152 = arith.subf %137, %151 : vector<16x32xf32>
    %cst_74 = arith.constant 9.99999974E-6 : f32
    %153 = vector.broadcast %cst_74 : f32 to vector<16x1xf32>
    %154 = arith.addf %150, %153 : vector<16x1xf32>
    %155 = math.rsqrt %154 : vector<16x1xf32>
    %156 = vector.broadcast %155 : vector<16x1xf32> to vector<16x32xf32>
    %157 = arith.mulf %152, %156 : vector<16x32xf32>
    %158 = vector.broadcast %138 : vector<1x32xf32> to vector<16x32xf32>
    %159 = arith.mulf %157, %158 : vector<16x32xf32>
    %160 = vector.broadcast %139 : vector<1x32xf32> to vector<16x32xf32>
    %161 = arith.addf %159, %160 : vector<16x32xf32>
    %c0_75 = arith.constant 0 : index
    %c0_76 = arith.constant 0 : index
    %162 = vector.load %arg28[%c0_75, %c0_76] : memref<8x32xf32, #tpu.memory_space<vmem>>, vector<8x32xf32>
    "tpu.trace_start"() <{level = 10 : i32, message = "md,nd->mn"}> : () -> ()
    %cst_77 = arith.constant dense<0.000000e+00> : vector<8x16xf32>
    %163 = tpu.matmul %162, %161, %cst_77 {dimension_numbers = #tpu.dot_dimension_numbers<[1], [1], [0], [0], [0, 0, 1, 0], [], []>} : vector<8x32xf32>, vector<16x32xf32>, vector<8x16xf32> -> vector<8x16xf32>
    "tpu.trace_stop"() : () -> ()
    %cst_78 = arith.constant 0.176776692 : f32
    %164 = vector.broadcast %cst_78 : f32 to vector<8x16xf32>
    %165 = arith.mulf %163, %164 : vector<8x16xf32>
    %cst_79 = arith.constant dense<0xFF800000> : vector<8xf32>
    %166 = vector.multi_reduction <maximumf>, %165, %cst_79 [1] : vector<8x16xf32> to vector<8xf32>
    %167 = vector.shape_cast %166 : vector<8xf32> to vector<8x1xf32>
    %168 = vector.broadcast %167 : vector<8x1xf32> to vector<8x16xf32>
    %169 = arith.subf %165, %168 : vector<8x16xf32>
    %170 = math.exp %169 : vector<8x16xf32>
    %cst_80 = arith.constant dense<0.000000e+00> : vector<8xf32>
    %171 = vector.multi_reduction <add>, %170, %cst_80 [1] : vector<8x16xf32> to vector<8xf32>
    %172 = vector.shape_cast %171 : vector<8xf32> to vector<8x1xf32>
    %173 = tpu.reciprocal %172 {approx = true} : vector<8x1xf32> -> vector<8x1xf32>
    %174 = arith.mulf %172, %173 : vector<8x1xf32>
    %cst_81 = arith.constant 2.000000e+00 : f32
    %175 = vector.broadcast %cst_81 : f32 to vector<8x1xf32>
    %176 = arith.subf %175, %174 : vector<8x1xf32>
    %177 = arith.mulf %173, %176 : vector<8x1xf32>
    %178 = vector.broadcast %177 : vector<8x1xf32> to vector<8x16xf32>
    %179 = arith.mulf %170, %178 : vector<8x16xf32>
    %cst_82 = arith.constant dense<0.000000e+00> : vector<8x32xf32>
    %180 = tpu.matmul %179, %161, %cst_82 {dimension_numbers = #tpu.dot_dimension_numbers<[1], [0], [0], [1], [0, 0, 1, 1], [], []>} : vector<8x16xf32>, vector<16x32xf32>, vector<8x32xf32> -> vector<8x32xf32>
    %c0_83 = arith.constant 0 : index
    %c0_84 = arith.constant 0 : index
    %181 = vector.load %arg14[%c0_83, %c0_84] : memref<1x32xf32, #tpu.memory_space<vmem>>, vector<1x32xf32>
    %c0_85 = arith.constant 0 : index
    %c0_86 = arith.constant 0 : index
    %182 = vector.load %arg15[%c0_85, %c0_86] : memref<1x32xf32, #tpu.memory_space<vmem>>, vector<1x32xf32>
    %cst_87 = arith.constant dense<0.000000e+00> : vector<8xf32>
    %183 = vector.multi_reduction <add>, %180, %cst_87 [1] : vector<8x32xf32> to vector<8xf32>
    %184 = vector.shape_cast %183 : vector<8xf32> to vector<8x1xf32>
    %cst_88 = arith.constant 3.200000e+01 : f32
    %185 = vector.broadcast %cst_88 : f32 to vector<8x1xf32>
    %186 = arith.divf %184, %185 : vector<8x1xf32>
    %187 = vector.broadcast %186 : vector<8x1xf32> to vector<8x32xf32>
    %188 = arith.subf %180, %187 : vector<8x32xf32>
    %189 = arith.mulf %188, %188 : vector<8x32xf32>
    %cst_89 = arith.constant dense<0.000000e+00> : vector<8xf32>
    %190 = vector.multi_reduction <add>, %189, %cst_89 [1] : vector<8x32xf32> to vector<8xf32>
    %191 = vector.shape_cast %190 : vector<8xf32> to vector<8x1xf32>
    %cst_90 = arith.constant 3.200000e+01 : f32
    %192 = vector.broadcast %cst_90 : f32 to vector<8x1xf32>
    %193 = arith.divf %191, %192 : vector<8x1xf32>
    %194 = vector.broadcast %186 : vector<8x1xf32> to vector<8x32xf32>
    %195 = arith.subf %180, %194 : vector<8x32xf32>
    %cst_91 = arith.constant 9.99999974E-6 : f32
    %196 = vector.broadcast %cst_91 : f32 to vector<8x1xf32>
    %197 = arith.addf %193, %196 : vector<8x1xf32>
    %198 = math.rsqrt %197 : vector<8x1xf32>
    %199 = vector.broadcast %198 : vector<8x1xf32> to vector<8x32xf32>
    %200 = arith.mulf %195, %199 : vector<8x32xf32>
    %201 = vector.broadcast %181 : vector<1x32xf32> to vector<8x32xf32>
    %202 = arith.mulf %200, %201 : vector<8x32xf32>
    %203 = vector.broadcast %182 : vector<1x32xf32> to vector<8x32xf32>
    %204 = arith.addf %202, %203 : vector<8x32xf32>
    %205 = vector.shape_cast %204 : vector<8x32xf32> to vector<1x8x32xf32>
    %206 = vector.broadcast %205 : vector<1x8x32xf32> to vector<2x8x32xf32>
    %c0_92 = arith.constant 0 : index
    %c0_93 = arith.constant 0 : index
    %c0_94 = arith.constant 0 : index
    %207 = vector.load %arg16[%c0_92, %c0_93, %c0_94] : memref<2x32x8xf32, #tpu.memory_space<vmem>>, vector<2x32x8xf32>
    "tpu.trace_start"() <{level = 10 : i32, message = "hnd,hde->hne"}> : () -> ()
    %cst_95 = arith.constant dense<0.000000e+00> : vector<2x8x8xf32>
    %208 = tpu.matmul %206, %207, %cst_95 {dimension_numbers = #tpu.dot_dimension_numbers<[2], [1], [1], [2], [0, 0, 0, 1, 1, 2], [0], [0]>} : vector<2x8x32xf32>, vector<2x32x8xf32>, vector<2x8x8xf32> -> vector<2x8x8xf32>
    "tpu.trace_stop"() : () -> ()
    %c0_96 = arith.constant 0 : index
    %c0_97 = arith.constant 0 : index
    %c0_98 = arith.constant 0 : index
    %209 = vector.load %arg17[%c0_96, %c0_97, %c0_98] : memref<2x32x8xf32, #tpu.memory_space<vmem>>, vector<2x32x8xf32>
    "tpu.trace_start"() <{level = 10 : i32, message = "hnd,hde->hne"}> : () -> ()
    %cst_99 = arith.constant dense<0.000000e+00> : vector<2x8x8xf32>
    %210 = tpu.matmul %206, %209, %cst_99 {dimension_numbers = #tpu.dot_dimension_numbers<[2], [1], [1], [2], [0, 0, 0, 1, 1, 2], [0], [0]>} : vector<2x8x32xf32>, vector<2x32x8xf32>, vector<2x8x8xf32> -> vector<2x8x8xf32>
    "tpu.trace_stop"() : () -> ()
    %c0_100 = arith.constant 0 : index
    %c0_101 = arith.constant 0 : index
    %c0_102 = arith.constant 0 : index
    %211 = vector.load %arg18[%c0_100, %c0_101, %c0_102] : memref<2x32x8xf32, #tpu.memory_space<vmem>>, vector<2x32x8xf32>
    "tpu.trace_start"() <{level = 10 : i32, message = "hnd,hde->hne"}> : () -> ()
    %cst_103 = arith.constant dense<0.000000e+00> : vector<2x8x8xf32>
    %212 = tpu.matmul %206, %211, %cst_103 {dimension_numbers = #tpu.dot_dimension_numbers<[2], [1], [1], [2], [0, 0, 0, 1, 1, 2], [0], [0]>} : vector<2x8x32xf32>, vector<2x32x8xf32>, vector<2x8x8xf32> -> vector<2x8x8xf32>
    "tpu.trace_stop"() : () -> ()
    "tpu.trace_start"() <{level = 10 : i32, message = "hne,hme->hnm"}> : () -> ()
    %cst_104 = arith.constant dense<0.000000e+00> : vector<2x8x8xf32>
    %213 = tpu.matmul %208, %210, %cst_104 {dimension_numbers = #tpu.dot_dimension_numbers<[2], [2], [1], [1], [0, 0, 0, 1, 1, 1], [0], [0]>} : vector<2x8x8xf32>, vector<2x8x8xf32>, vector<2x8x8xf32> -> vector<2x8x8xf32>
    "tpu.trace_stop"() : () -> ()
    %cst_105 = arith.constant 0.353553385 : f32
    %214 = vector.broadcast %cst_105 : f32 to vector<2x8x8xf32>
    %215 = arith.mulf %213, %214 : vector<2x8x8xf32>
    %cst_106 = arith.constant dense<0xFF800000> : vector<2x8xf32>
    %216 = vector.multi_reduction <maximumf>, %215, %cst_106 [2] : vector<2x8x8xf32> to vector<2x8xf32>
    %217 = vector.shape_cast %216 : vector<2x8xf32> to vector<2x8x1xf32>
    %218 = vector.broadcast %217 : vector<2x8x1xf32> to vector<2x8x8xf32>
    %219 = arith.subf %215, %218 : vector<2x8x8xf32>
    %220 = math.exp %219 : vector<2x8x8xf32>
    %cst_107 = arith.constant dense<0.000000e+00> : vector<2x8xf32>
    %221 = vector.multi_reduction <add>, %220, %cst_107 [2] : vector<2x8x8xf32> to vector<2x8xf32>
    %222 = vector.shape_cast %221 : vector<2x8xf32> to vector<2x8x1xf32>
    %223 = tpu.reciprocal %222 {approx = true} : vector<2x8x1xf32> -> vector<2x8x1xf32>
    %224 = arith.mulf %222, %223 : vector<2x8x1xf32>
    %cst_108 = arith.constant 2.000000e+00 : f32
    %225 = vector.broadcast %cst_108 : f32 to vector<2x8x1xf32>
    %226 = arith.subf %225, %224 : vector<2x8x1xf32>
    %227 = arith.mulf %223, %226 : vector<2x8x1xf32>
    %228 = vector.broadcast %227 : vector<2x8x1xf32> to vector<2x8x8xf32>
    %229 = arith.mulf %220, %228 : vector<2x8x8xf32>
    "tpu.trace_start"() <{level = 10 : i32, message = "hnm,hme->hne"}> : () -> ()
    %cst_109 = arith.constant dense<0.000000e+00> : vector<2x8x8xf32>
    %230 = tpu.matmul %229, %212, %cst_109 {dimension_numbers = #tpu.dot_dimension_numbers<[2], [1], [1], [2], [0, 0, 0, 1, 1, 2], [0], [0]>} : vector<2x8x8xf32>, vector<2x8x8xf32>, vector<2x8x8xf32> -> vector<2x8x8xf32>
    "tpu.trace_stop"() : () -> ()
    %c0_110 = arith.constant 0 : index
    %c0_111 = arith.constant 0 : index
    %c0_112 = arith.constant 0 : index
    %231 = vector.load %arg19[%c0_110, %c0_111, %c0_112] : memref<2x8x32xf32, #tpu.memory_space<vmem>>, vector<2x8x32xf32>
    "tpu.trace_start"() <{level = 10 : i32, message = "hne,heD->hnD"}> : () -> ()
    %cst_113 = arith.constant dense<0.000000e+00> : vector<2x8x32xf32>
    %232 = tpu.matmul %230, %231, %cst_113 {dimension_numbers = #tpu.dot_dimension_numbers<[2], [1], [1], [2], [0, 0, 0, 1, 1, 2], [0], [0]>} : vector<2x8x8xf32>, vector<2x8x32xf32>, vector<2x8x32xf32> -> vector<2x8x32xf32>
    "tpu.trace_stop"() : () -> ()
    %233 = vector.extract_strided_slice %232 {offsets = [0, 0, 0], sizes = [1, 8, 32], strides = [1, 1, 1]} : vector<2x8x32xf32> to vector<1x8x32xf32>
    %234 = vector.shape_cast %233 : vector<1x8x32xf32> to vector<8x32xf32>
    %235 = vector.extract_strided_slice %232 {offsets = [1, 0, 0], sizes = [1, 8, 32], strides = [1, 1, 1]} : vector<2x8x32xf32> to vector<1x8x32xf32>
    %236 = vector.shape_cast %235 : vector<1x8x32xf32> to vector<8x32xf32>
    %237 = arith.addf %234, %236 : vector<8x32xf32>
    %238 = arith.addf %180, %237 : vector<8x32xf32>
    %c0_114 = arith.constant 0 : index
    %c0_115 = arith.constant 0 : index
    %239 = vector.load %arg20[%c0_114, %c0_115] : memref<1x32xf32, #tpu.memory_space<vmem>>, vector<1x32xf32>
    %c0_116 = arith.constant 0 : index
    %c0_117 = arith.constant 0 : index
    %240 = vector.load %arg21[%c0_116, %c0_117] : memref<1x32xf32, #tpu.memory_space<vmem>>, vector<1x32xf32>
    %cst_118 = arith.constant dense<0.000000e+00> : vector<8xf32>
    %241 = vector.multi_reduction <add>, %238, %cst_118 [1] : vector<8x32xf32> to vector<8xf32>
    %242 = vector.shape_cast %241 : vector<8xf32> to vector<8x1xf32>
    %cst_119 = arith.constant 3.200000e+01 : f32
    %243 = vector.broadcast %cst_119 : f32 to vector<8x1xf32>
    %244 = arith.divf %242, %243 : vector<8x1xf32>
    %245 = vector.broadcast %244 : vector<8x1xf32> to vector<8x32xf32>
    %246 = arith.subf %238, %245 : vector<8x32xf32>
    %247 = arith.mulf %246, %246 : vector<8x32xf32>
    %cst_120 = arith.constant dense<0.000000e+00> : vector<8xf32>
    %248 = vector.multi_reduction <add>, %247, %cst_120 [1] : vector<8x32xf32> to vector<8xf32>
    %249 = vector.shape_cast %248 : vector<8xf32> to vector<8x1xf32>
    %cst_121 = arith.constant 3.200000e+01 : f32
    %250 = vector.broadcast %cst_121 : f32 to vector<8x1xf32>
    %251 = arith.divf %249, %250 : vector<8x1xf32>
    %252 = vector.broadcast %244 : vector<8x1xf32> to vector<8x32xf32>
    %253 = arith.subf %238, %252 : vector<8x32xf32>
    %cst_122 = arith.constant 9.99999974E-6 : f32
    %254 = vector.broadcast %cst_122 : f32 to vector<8x1xf32>
    %255 = arith.addf %251, %254 : vector<8x1xf32>
    %256 = math.rsqrt %255 : vector<8x1xf32>
    %257 = vector.broadcast %256 : vector<8x1xf32> to vector<8x32xf32>
    %258 = arith.mulf %253, %257 : vector<8x32xf32>
    %259 = vector.broadcast %239 : vector<1x32xf32> to vector<8x32xf32>
    %260 = arith.mulf %258, %259 : vector<8x32xf32>
    %261 = vector.broadcast %240 : vector<1x32xf32> to vector<8x32xf32>
    %262 = arith.addf %260, %261 : vector<8x32xf32>
    %c0_123 = arith.constant 0 : index
    %c0_124 = arith.constant 0 : index
    %263 = vector.load %arg22[%c0_123, %c0_124] : memref<32x64xf32, #tpu.memory_space<vmem>>, vector<32x64xf32>
    %cst_125 = arith.constant dense<0.000000e+00> : vector<8x64xf32>
    %264 = tpu.matmul %262, %263, %cst_125 {dimension_numbers = #tpu.dot_dimension_numbers<[1], [0], [0], [1], [0, 0, 1, 1], [], []>} : vector<8x32xf32>, vector<32x64xf32>, vector<8x64xf32> -> vector<8x64xf32>
    %c0_126 = arith.constant 0 : index
    %c0_127 = arith.constant 0 : index
    %265 = vector.load %arg23[%c0_126, %c0_127] : memref<1x64xf32, #tpu.memory_space<vmem>>, vector<1x64xf32>
    %266 = vector.broadcast %265 : vector<1x64xf32> to vector<8x64xf32>
    %267 = arith.addf %264, %266 : vector<8x64xf32>
    %cst_128 = arith.constant 5.000000e-01 : f32
    %268 = vector.broadcast %cst_128 : f32 to vector<8x64xf32>
    %269 = arith.mulf %268, %267 : vector<8x64xf32>
    %cst_129 = arith.constant 0.707106769 : f32
    %270 = vector.broadcast %cst_129 : f32 to vector<8x64xf32>
    %271 = arith.mulf %267, %270 : vector<8x64xf32>
    %272 = math.absf %271 : vector<8x64xf32>
    %cst_130 = arith.constant 0.327591091 : f32
    %273 = vector.broadcast %cst_130 : f32 to vector<8x64xf32>
    %274 = arith.mulf %273, %272 : vector<8x64xf32>
    %cst_131 = arith.constant 1.000000e+00 : f32
    %275 = vector.broadcast %cst_131 : f32 to vector<8x64xf32>
    %276 = arith.addf %275, %274 : vector<8x64xf32>
    %277 = tpu.reciprocal %276 {approx = true} : vector<8x64xf32> -> vector<8x64xf32>
    %278 = arith.mulf %276, %277 : vector<8x64xf32>
    %cst_132 = arith.constant 2.000000e+00 : f32
    %279 = vector.broadcast %cst_132 : f32 to vector<8x64xf32>
    %280 = arith.subf %279, %278 : vector<8x64xf32>
    %281 = arith.mulf %277, %280 : vector<8x64xf32>
    %cst_133 = arith.constant 1.06140542 : f32
    %282 = vector.broadcast %cst_133 : f32 to vector<8x64xf32>
    %283 = arith.mulf %281, %282 : vector<8x64xf32>
    %cst_134 = arith.constant -1.45315206 : f32
    %284 = vector.broadcast %cst_134 : f32 to vector<8x64xf32>
    %285 = arith.addf %284, %283 : vector<8x64xf32>
    %286 = arith.mulf %281, %285 : vector<8x64xf32>
    %cst_135 = arith.constant 1.42141378 : f32
    %287 = vector.broadcast %cst_135 : f32 to vector<8x64xf32>
    %288 = arith.addf %287, %286 : vector<8x64xf32>
    %289 = arith.mulf %281, %288 : vector<8x64xf32>
    %cst_136 = arith.constant -0.284496725 : f32
    %290 = vector.broadcast %cst_136 : f32 to vector<8x64xf32>
    %291 = arith.addf %290, %289 : vector<8x64xf32>
    %292 = arith.mulf %281, %291 : vector<8x64xf32>
    %cst_137 = arith.constant 0.254829586 : f32
    %293 = vector.broadcast %cst_137 : f32 to vector<8x64xf32>
    %294 = arith.addf %293, %292 : vector<8x64xf32>
    %295 = arith.mulf %281, %294 : vector<8x64xf32>
    %cst_138 = arith.constant 0.000000e+00 : f32
    %296 = vector.broadcast %cst_138 : f32 to vector<8x64xf32>
    %297 = arith.subf %296, %272 : vector<8x64xf32>
    %298 = arith.mulf %297, %272 : vector<8x64xf32>
    %299 = math.exp %298 : vector<8x64xf32>
    %300 = arith.mulf %295, %299 : vector<8x64xf32>
    %cst_139 = arith.constant 1.000000e+00 : f32
    %301 = vector.broadcast %cst_139 : f32 to vector<8x64xf32>
    %302 = arith.subf %301, %300 : vector<8x64xf32>
    %cst_140 = arith.constant 0.000000e+00 : f32
    %303 = vector.broadcast %cst_140 : f32 to vector<8x64xf32>
    %304 = arith.cmpf oge, %271, %303 : vector<8x64xf32>
    %cst_141 = arith.constant 0.000000e+00 : f32
    %305 = vector.broadcast %cst_141 : f32 to vector<8x64xf32>
    %306 = arith.subf %305, %302 : vector<8x64xf32>
    %307 = arith.select %304, %302, %306 : vector<8x64xi1>, vector<8x64xf32>
    %cst_142 = arith.constant 1.000000e+00 : f32
    %308 = vector.broadcast %cst_142 : f32 to vector<8x64xf32>
    %309 = arith.addf %308, %307 : vector<8x64xf32>
    %310 = arith.mulf %269, %309 : vector<8x64xf32>
    %c0_143 = arith.constant 0 : index
    %c0_144 = arith.constant 0 : index
    %311 = vector.load %arg24[%c0_143, %c0_144] : memref<64x32xf32, #tpu.memory_space<vmem>>, vector<64x32xf32>
    %cst_145 = arith.constant dense<0.000000e+00> : vector<8x32xf32>
    %312 = tpu.matmul %310, %311, %cst_145 {dimension_numbers = #tpu.dot_dimension_numbers<[1], [0], [0], [1], [0, 0, 1, 1], [], []>} : vector<8x64xf32>, vector<64x32xf32>, vector<8x32xf32> -> vector<8x32xf32>
    %c0_146 = arith.constant 0 : index
    %c0_147 = arith.constant 0 : index
    %313 = vector.load %arg25[%c0_146, %c0_147] : memref<1x32xf32, #tpu.memory_space<vmem>>, vector<1x32xf32>
    %314 = vector.broadcast %313 : vector<1x32xf32> to vector<8x32xf32>
    %315 = arith.addf %312, %314 : vector<8x32xf32>
    %316 = arith.addf %238, %315 : vector<8x32xf32>
    %c0_148 = arith.constant 0 : index
    %c0_149 = arith.constant 0 : index
    %317 = vector.load %arg29[%c0_148, %c0_149] : memref<1x32xf32, #tpu.memory_space<vmem>>, vector<1x32xf32>
    %c0_150 = arith.constant 0 : index
    %c0_151 = arith.constant 0 : index
    %318 = vector.load %arg30[%c0_150, %c0_151] : memref<1x32xf32, #tpu.memory_space<vmem>>, vector<1x32xf32>
    %cst_152 = arith.constant dense<0.000000e+00> : vector<8xf32>
    %319 = vector.multi_reduction <add>, %316, %cst_152 [1] : vector<8x32xf32> to vector<8xf32>
    %320 = vector.shape_cast %319 : vector<8xf32> to vector<8x1xf32>
    %cst_153 = arith.constant 3.200000e+01 : f32
    %321 = vector.broadcast %cst_153 : f32 to vector<8x1xf32>
    %322 = arith.divf %320, %321 : vector<8x1xf32>
    %323 = vector.broadcast %322 : vector<8x1xf32> to vector<8x32xf32>
    %324 = arith.subf %316, %323 : vector<8x32xf32>
    %325 = arith.mulf %324, %324 : vector<8x32xf32>
    %cst_154 = arith.constant dense<0.000000e+00> : vector<8xf32>
    %326 = vector.multi_reduction <add>, %325, %cst_154 [1] : vector<8x32xf32> to vector<8xf32>
    %327 = vector.shape_cast %326 : vector<8xf32> to vector<8x1xf32>
    %cst_155 = arith.constant 3.200000e+01 : f32
    %328 = vector.broadcast %cst_155 : f32 to vector<8x1xf32>
    %329 = arith.divf %327, %328 : vector<8x1xf32>
    %330 = vector.broadcast %322 : vector<8x1xf32> to vector<8x32xf32>
    %331 = arith.subf %316, %330 : vector<8x32xf32>
    %cst_156 = arith.constant 9.99999974E-6 : f32
    %332 = vector.broadcast %cst_156 : f32 to vector<8x1xf32>
    %333 = arith.addf %329, %332 : vector<8x1xf32>
    %334 = math.rsqrt %333 : vector<8x1xf32>
    %335 = vector.broadcast %334 : vector<8x1xf32> to vector<8x32xf32>
    %336 = arith.mulf %331, %335 : vector<8x32xf32>
    %337 = vector.broadcast %317 : vector<1x32xf32> to vector<8x32xf32>
    %338 = arith.mulf %336, %337 : vector<8x32xf32>
    %339 = vector.broadcast %318 : vector<1x32xf32> to vector<8x32xf32>
    %340 = arith.addf %338, %339 : vector<8x32xf32>
    %c0_157 = arith.constant 0 : index
    %c0_158 = arith.constant 0 : index
    %c0_159 = arith.constant 0 : index
    %341 = vector.load %arg31[%c0_157, %c0_158, %c0_159] : memref<1x8x32xf32, #tpu.memory_space<vmem>>, vector<1x8x32xf32>
    %342 = vector.shape_cast %341 : vector<1x8x32xf32> to vector<8x32xf32>
    %343 = vector.shape_cast %340 : vector<8x32xf32> to vector<1x8x32xf32>
    tpu.vector_store %arg31[%c0_157, %c0_158, %c0_159], %343 {strides = array<i32>} : memref<1x8x32xf32, #tpu.memory_space<vmem>>, vector<1x8x32xf32>,
    return
  }
  func.func @transform_0(%arg0: i32) -> (i32, i32, i32) {
    %c0_i32 = arith.constant 0 : i32
    %c0_i32_0 = arith.constant 0 : i32
    %c0_i32_1 = arith.constant 0 : i32
    return %arg0, %c0_i32, %c0_i32_0 : i32, i32, i32
  }
  func.func @transform_1(%arg0: i32) -> (i32, i32) {
    %c0_i32 = arith.constant 0 : i32
    %c0_i32_0 = arith.constant 0 : i32
    %c0_i32_1 = arith.constant 0 : i32
    return %c0_i32, %c0_i32_0 : i32, i32
  }
  func.func @transform_2(%arg0: i32) -> (i32, i32) {
    %c0_i32 = arith.constant 0 : i32
    %c0_i32_0 = arith.constant 0 : i32
    %c0_i32_1 = arith.constant 0 : i32
    return %c0_i32, %c0_i32_0 : i32, i32
  }
  func.func @transform_3(%arg0: i32) -> (i32, i32, i32) {
    %c0_i32 = arith.constant 0 : i32
    %c0_i32_0 = arith.constant 0 : i32
    %c0_i32_1 = arith.constant 0 : i32
    %c0_i32_2 = arith.constant 0 : i32
    return %c0_i32, %c0_i32_0, %c0_i32_1 : i32, i32, i32
  }
  func.func @transform_4(%arg0: i32) -> (i32, i32, i32) {
    %c0_i32 = arith.constant 0 : i32
    %c0_i32_0 = arith.constant 0 : i32
    %c0_i32_1 = arith.constant 0 : i32
    %c0_i32_2 = arith.constant 0 : i32
    return %c0_i32, %c0_i32_0, %c0_i32_1 : i32, i32, i32
  }
  func.func @transform_5(%arg0: i32) -> (i32, i32, i32) {
    %c0_i32 = arith.constant 0 : i32
    %c0_i32_0 = arith.constant 0 : i32
    %c0_i32_1 = arith.constant 0 : i32
    %c0_i32_2 = arith.constant 0 : i32
    return %c0_i32, %c0_i32_0, %c0_i32_1 : i32, i32, i32
  }
  func.func @transform_6(%arg0: i32) -> (i32, i32, i32) {
    %c0_i32 = arith.constant 0 : i32
    %c0_i32_0 = arith.constant 0 : i32
    %c0_i32_1 = arith.constant 0 : i32
    %c0_i32_2 = arith.constant 0 : i32
    return %c0_i32, %c0_i32_0, %c0_i32_1 : i32, i32, i32
  }
  func.func @transform_7(%arg0: i32) -> (i32, i32) {
    %c0_i32 = arith.constant 0 : i32
    %c0_i32_0 = arith.constant 0 : i32
    %c0_i32_1 = arith.constant 0 : i32
    return %c0_i32, %c0_i32_0 : i32, i32
  }
  func.func @transform_8(%arg0: i32) -> (i32, i32) {
    %c0_i32 = arith.constant 0 : i32
    %c0_i32_0 = arith.constant 0 : i32
    %c0_i32_1 = arith.constant 0 : i32
    return %c0_i32, %c0_i32_0 : i32, i32
  }
  func.func @transform_9(%arg0: i32) -> (i32, i32) {
    %c0_i32 = arith.constant 0 : i32
    %c0_i32_0 = arith.constant 0 : i32
    %c0_i32_1 = arith.constant 0 : i32
    return %c0_i32, %c0_i32_0 : i32, i32
  }
  func.func @transform_10(%arg0: i32) -> (i32, i32) {
    %c0_i32 = arith.constant 0 : i32
    %c0_i32_0 = arith.constant 0 : i32
    %c0_i32_1 = arith.constant 0 : i32
    return %c0_i32, %c0_i32_0 : i32, i32
  }
  func.func @transform_11(%arg0: i32) -> (i32, i32) {
    %c0_i32 = arith.constant 0 : i32
    %c0_i32_0 = arith.constant 0 : i32
    %c0_i32_1 = arith.constant 0 : i32
    return %c0_i32, %c0_i32_0 : i32, i32
  }
  func.func @transform_12(%arg0: i32) -> (i32, i32) {
    %c0_i32 = arith.constant 0 : i32
    %c0_i32_0 = arith.constant 0 : i32
    %c0_i32_1 = arith.constant 0 : i32
    return %c0_i32, %c0_i32_0 : i32, i32
  }
  func.func @transform_13(%arg0: i32) -> (i32, i32) {
    %c0_i32 = arith.constant 0 : i32
    %c0_i32_0 = arith.constant 0 : i32
    %c0_i32_1 = arith.constant 0 : i32
    return %c0_i32, %c0_i32_0 : i32, i32
  }
  func.func @transform_14(%arg0: i32) -> (i32, i32) {
    %c0_i32 = arith.constant 0 : i32
    %c0_i32_0 = arith.constant 0 : i32
    %c0_i32_1 = arith.constant 0 : i32
    return %c0_i32, %c0_i32_0 : i32, i32
  }
  func.func @transform_15(%arg0: i32) -> (i32, i32, i32) {
    %c0_i32 = arith.constant 0 : i32
    %c0_i32_0 = arith.constant 0 : i32
    %c0_i32_1 = arith.constant 0 : i32
    %c0_i32_2 = arith.constant 0 : i32
    return %c0_i32, %c0_i32_0, %c0_i32_1 : i32, i32, i32
  }
  func.func @transform_16(%arg0: i32) -> (i32, i32, i32) {
    %c0_i32 = arith.constant 0 : i32
    %c0_i32_0 = arith.constant 0 : i32
    %c0_i32_1 = arith.constant 0 : i32
    %c0_i32_2 = arith.constant 0 : i32
    return %c0_i32, %c0_i32_0, %c0_i32_1 : i32, i32, i32
  }
  func.func @transform_17(%arg0: i32) -> (i32, i32, i32) {
    %c0_i32 = arith.constant 0 : i32
    %c0_i32_0 = arith.constant 0 : i32
    %c0_i32_1 = arith.constant 0 : i32
    %c0_i32_2 = arith.constant 0 : i32
    return %c0_i32, %c0_i32_0, %c0_i32_1 : i32, i32, i32
  }
  func.func @transform_18(%arg0: i32) -> (i32, i32, i32) {
    %c0_i32 = arith.constant 0 : i32
    %c0_i32_0 = arith.constant 0 : i32
    %c0_i32_1 = arith.constant 0 : i32
    %c0_i32_2 = arith.constant 0 : i32
    return %c0_i32, %c0_i32_0, %c0_i32_1 : i32, i32, i32
  }
  func.func @transform_19(%arg0: i32) -> (i32, i32) {
    %c0_i32 = arith.constant 0 : i32
    %c0_i32_0 = arith.constant 0 : i32
    %c0_i32_1 = arith.constant 0 : i32
    return %c0_i32, %c0_i32_0 : i32, i32
  }
  func.func @transform_20(%arg0: i32) -> (i32, i32) {
    %c0_i32 = arith.constant 0 : i32
    %c0_i32_0 = arith.constant 0 : i32
    %c0_i32_1 = arith.constant 0 : i32
    return %c0_i32, %c0_i32_0 : i32, i32
  }
  func.func @transform_21(%arg0: i32) -> (i32, i32) {
    %c0_i32 = arith.constant 0 : i32
    %c0_i32_0 = arith.constant 0 : i32
    %c0_i32_1 = arith.constant 0 : i32
    return %c0_i32, %c0_i32_0 : i32, i32
  }
  func.func @transform_22(%arg0: i32) -> (i32, i32) {
    %c0_i32 = arith.constant 0 : i32
    %c0_i32_0 = arith.constant 0 : i32
    %c0_i32_1 = arith.constant 0 : i32
    return %c0_i32, %c0_i32_0 : i32, i32
  }
  func.func @transform_23(%arg0: i32) -> (i32, i32) {
    %c0_i32 = arith.constant 0 : i32
    %c0_i32_0 = arith.constant 0 : i32
    %c0_i32_1 = arith.constant 0 : i32
    return %c0_i32, %c0_i32_0 : i32, i32
  }
  func.func @transform_24(%arg0: i32) -> (i32, i32) {
    %c0_i32 = arith.constant 0 : i32
    %c0_i32_0 = arith.constant 0 : i32
    %c0_i32_1 = arith.constant 0 : i32
    return %c0_i32, %c0_i32_0 : i32, i32
  }
  func.func @transform_25(%arg0: i32) -> (i32, i32) {
    %c0_i32 = arith.constant 0 : i32
    %c0_i32_0 = arith.constant 0 : i32
    %c0_i32_1 = arith.constant 0 : i32
    return %c0_i32, %c0_i32_0 : i32, i32
  }
  func.func @transform_26(%arg0: i32) -> (i32, i32) {
    %c0_i32 = arith.constant 0 : i32
    %c0_i32_0 = arith.constant 0 : i32
    %c0_i32_1 = arith.constant 0 : i32
    return %c0_i32, %c0_i32_0 : i32, i32
  }
  func.func @transform_27(%arg0: i32) -> (i32, i32) {
    %c0_i32 = arith.constant 0 : i32
    %c0_i32_0 = arith.constant 0 : i32
    %c0_i32_1 = arith.constant 0 : i32
    return %c0_i32, %c0_i32_0 : i32, i32
  }
  func.func @transform_28(%arg0: i32) -> (i32, i32) {
    %c0_i32 = arith.constant 0 : i32
    %c0_i32_0 = arith.constant 0 : i32
    %c0_i32_1 = arith.constant 0 : i32
    return %c0_i32, %c0_i32_0 : i32, i32
  }
  func.func @transform_29(%arg0: i32) -> (i32, i32) {
    %c0_i32 = arith.constant 0 : i32
    %c0_i32_0 = arith.constant 0 : i32
    %c0_i32_1 = arith.constant 0 : i32
    return %c0_i32, %c0_i32_0 : i32, i32
  }
  func.func @transform_30(%arg0: i32) -> (i32, i32, i32) {
    %c0_i32 = arith.constant 0 : i32
    %c0_i32_0 = arith.constant 0 : i32
    %c0_i32_1 = arith.constant 0 : i32
    return %arg0, %c0_i32, %c0_i32_0 : i32, i32, i32
  }
}

</mosaic_0001>

<bundles_post_ra>
// kernel: tpu_custom_call.1
= control target key start
LH: loop header
LB: loop body
LE: loop exit
PB: predicated region body
PF: predicated region fallthrough
CT: control target
= control target key end

     0   :  { %s2633_s6 = smov 1   ;;  %s2634_s10 = smov 2   ;;  %s3160_s0 = inlined_call_operand.smem [shape: u32[31], index: -1, kind: input, shape index: {}] }
   0x1   :  { %s2672_s5 = sld [smem:[%s3160_s0]]   ;;  %s2635_s14 = smov 3  }
   0x2   :  { %s2677_s9 = sld [smem:[%s3160_s0 + %s2633_s6]]   ;;  %s2636_s18 = smov 4  }
   0x3   :  { %s2682_s13 = sld [smem:[%s3160_s0 + %s2634_s10]]   ;;  %s2637_s22 = smov 5  }
   0x4   :  { %s2687_s17 = sld [smem:[%s3160_s0 + %s2635_s14]]   ;;  %s2638_s26 = smov 6  }
   0x5   :  { %s2692_s21 = sld [smem:[%s3160_s0 + %s2636_s18]]   ;;  %s2639_s30 = smov 7  }
   0x6   :  { %s2697_s25 = sld [smem:[%s3160_s0 + %s2637_s22]]   ;;  %s2640_s4 = smov 8  }
   0x7   :  { %3171 = sst [smem:[#allocation5_spill]] %s2672_s5  ;;  %s2641_s10 = smov 9  }
   0x8   :  { %3172 = sst [smem:[#allocation6_spill]] %s2677_s9  ;;  %s2642_s15 = smov 10  }
   0x9   :  { %3173 = sst [smem:[#allocation7_spill]] %s2682_s13  ;;  %s2643_s20 = smov 11  }
   0xa   :  { %s2702_s29 = sld [smem:[%s3160_s0 + %s2638_s26]]   ;;  %s2644_s26 = smov 12  }
   0xb   :  { %s2707_s3 = sld [smem:[%s3160_s0 + %s2639_s30]]   ;;  %s2645_s1 = smov 13  }
   0xc   :  { %s2712_s8 = sld [smem:[%s3160_s0 + %s2640_s4]]   ;;  %s2646_s7 = smov 14  }
   0xd   :  { %s2717_s14 = sld [smem:[%s3160_s0 + %s2641_s10]]   ;;  %s2648_s22 = smov 16  }
   0xe   :  { %s2722_s19 = sld [smem:[%s3160_s0 + %s2642_s15]]   ;;  %s2647_s15 = smov 15  }
   0xf   :  { %s2727_s24 = sld [smem:[%s3160_s0 + %s2643_s20]]   ;;  %s2649_s28 = smov 17  }
  0x10   :  { %s2732_s30 = sld [smem:[%s3160_s0 + %s2644_s26]]  }
  0x11   :  { %3174 = sst [smem:[#allocation8_spill]] %s2707_s3 }
  0x12   :  { %3175 = sst [smem:[#allocation9_spill]] %s2712_s8 }
  0x13   :  { %s2737_s6 = sld [smem:[%s3160_s0 + %s2645_s1]]  }
  0x14   :  { %s2742_s12 = sld [smem:[%s3160_s0 + %s2646_s7]]   ;;  %s2650_s7 = smov 18  }
  0x15   :  { %s2747_s20 = sld [smem:[%s3160_s0 + %s2647_s15]]   ;;  %s2651_s15 = smov 19  }
  0x16   :  { %s2752_s27 = sld [smem:[%s3160_s0 + %s2648_s22]]   ;;  %s2652_s22 = smov 20  }
  0x17   :  { %s2757_s4 = sld [smem:[%s3160_s0 + %s2649_s28]]   ;;  %s2653_s28 = smov 21  }
  0x19   :  { %3176 = sst [smem:[#allocation10_spill]] %s2737_s6 }
  0x1a   :  { %3177 = sst [smem:[#allocation11_spill]] %s2742_s12 }
  0x1b   :  { %3178 = sst [smem:[#allocation12_spill]] %s2747_s20 }
  0x1c   :  { %3179 = sst [smem:[#allocation13_spill]] %s2752_s27 }
  0x1d   :  { %3180 = sst [smem:[#allocation14_spill]] %s2757_s4 }
  0x1e   :  { %s2762_s12 = sld [smem:[%s3160_s0 + %s2650_s7]]   ;;  %s2654_s7 = smov 22  }
  0x1f   :  { %s2767_s6 = sld [smem:[%s3160_s0 + %s2651_s15]]   ;;  %s2655_s15 = smov 23  }
  0x20   :  { %s2772_s27 = sld [smem:[%s3160_s0 + %s2652_s22]]   ;;  %s2656_s22 = smov 24  }
  0x21   :  { %s2777_s4 = sld [smem:[%s3160_s0 + %s2653_s28]]   ;;  %s2657_s28 = smov 25  }
  0x24   :  { %3181 = sst [smem:[#allocation15_spill]] %s2762_s12 }
  0x25   :  { %3182 = sst [smem:[#allocation16_spill]] %s2767_s6 }
  0x26   :  { %3183 = sst [smem:[#allocation17_spill]] %s2772_s27 }
  0x27   :  { %3184 = sst [smem:[#allocation18_spill]] %s2777_s4 }
  0x28   :  { %s2782_s12 = sld [smem:[%s3160_s0 + %s2654_s7]]   ;;  %s2658_s7 = smov 26  }
  0x29   :  { %s2787_s6 = sld [smem:[%s3160_s0 + %s2655_s15]]   ;;  %s2659_s15 = smov 27  }
  0x2a   :  { %s2792_s27 = sld [smem:[%s3160_s0 + %s2656_s22]]   ;;  %s2660_s22 = smov 28  }
  0x2b   :  { %s2797_s4 = sld [smem:[%s3160_s0 + %s2657_s28]]   ;;  %s2661_s28 = smov 29  }
  0x2c   :  { %s2817_s20 = sld [smem:[%s3160_s0 + %s2661_s28]]  }
  0x2e   :  { %3185 = sst [smem:[#allocation19_spill]] %s2782_s12 }
  0x2f   :  { %3186 = sst [smem:[#allocation20_spill]] %s2787_s6 }
  0x30   :  { %3187 = sst [smem:[#allocation21_spill]] %s2792_s27 }
  0x31   :  { %3188 = sst [smem:[#allocation22_spill]] %s2797_s4 }
  0x32   :  { %s2802_s12 = sld [smem:[%s3160_s0 + %s2658_s7]]   ;;  %s2662_s7 = smov 30  }
  0x33   :  { %s2807_s6 = sld [smem:[%s3160_s0 + %s2659_s15]]  }
  0x34   :  { %s2812_s27 = sld [smem:[%s3160_s0 + %s2660_s22]]  }
  0x38   :  { %3189 = sst [smem:[#allocation23_spill]] %s2802_s12 }
  0x39   :  { %3190 = sst [smem:[#allocation24_spill]] %s2807_s6 }
  0x3a   :  { %s2822_s12 = sld [smem:[%s3160_s0 + %s2662_s7]]  }
  0x3b   :  { %66 = vsyncpa [#allocation3], 0 }
  0x3c   :  { %68 = vsyncpa [#allocation3 + $0x1], 0  ;;  %s2824_s15 = smov 0   ;;  %s2826_s16 = smov 0  }
  0x3d   :  { %s2828_s18 = smov 0   ;;  %s2830_s22 = smov 0  }
  0x3e LB: > { %s2845_s0 = sadd.s32 4294967295, %s2631_s22   ;;  %s2359_s23 = sadd.s32 4294967294, %s2631_s22   ;;  %s2631_s22 = sphi %s2830_s22, %s3216_s22   ;;  %s2627_s18 = sphi %s2828_s18, %s3215_s18   ;;  %s2623_s16 = sphi %s2826_s16, %s3214_s16   ;;  %s2619_s15 = sphi %s2824_s15, %s3213_s15  }
  0x3f   : > { %s2849_s26 = sadd.s32 1, %s2631_s22   ;;  %s716_s28 = sadd.s32 1, %s2627_s18 }
  0x40   : > { %s713_s1 = ssub.s32 %s2631_s22, %s2849_s26  ;;  %p726_p0 = scmp.ne.s32.totalorder %s2627_s18, %s2623_s16 }
  0x41   : > { %p714_p1 = scmp.eq.s32.totalorder %s713_s1, 0  ;;  %p727_p2 = scmp.eq.s32.totalorder %s2845_s0, 1 }
  0x42   : > { %p732_p3 = scmp.ne.s32.totalorder %s2623_s16, %s2619_s15  ;;  %p733_p4 = scmp.eq.s32.totalorder %s2359_s23, 1 }
  0x43   : > { %s2860_s2 = scalar_select %p714_p1, %s2627_s18, %s716_s28  }
  0x44   : > { %p2862_p5 = por %p727_p2, %p726_p0  ;;  %p2866_p6 = por %p733_p4, %p732_p3 }
  0x45   : > { %p2362_p7 = scmp.ge.s32.totalorder %s2631_s22, 1  ;;  %p846_p8 = scmp.lt.s32.totalorder %s2631_s22, 3 }
  0x47   : > { %p847_p9 = pnand %p2362_p7, %p846_p8 }
  0x48   : > { %s3193_s5 = sld [smem:[#allocation5_spill]] (!%p847_p9)  ;;  %p924_p10 = scmp.lt.s32.totalorder (!%p847_p9), %s2845_s0, 1 }
  0x49   : > { %850 = sbr.rel (%p847_p9) target bundleno = 4458 (0x116a), region = 140  ;;  %s3194_s9 = sld [smem:[#allocation6_spill]] (!%p847_p9) }
  0x4a   : > { %s3195_s13 = sld [smem:[#allocation7_spill]] (!%p847_p9) }
  0x4b   : > { %s3196_s3 = sld [smem:[#allocation8_spill]] (!%p847_p9) }
  0x4c   : > { %s3197_s8 = sld [smem:[#allocation9_spill]] (!%p847_p9) }
  0x4d   : > { %s3198_s4 = sld [smem:[#allocation22_spill]] (!%p847_p9) }
  0x4e   : > { %s925_s11 = scalar_select %p924_p10, %s2845_s0, 1  ;;  %vm933_vm0 = vcmask 261120   ;;  %v2663_v4 = vmov 32.0   ;;  %v998_v21 = vld [vmem:[%s2687_s17 + $0x18] sm:$0xff]  ;;  %v997_v25 = vld [vmem:[%s2687_s17 + $0x10] sm:$0xff]  ;;  %v996_v29 = vld [vmem:[%s2687_s17 + $0x8] sm:$0xff] }
  0x4f   : > { %2509 = vrcp.f32 %v2663_v4  ;;  %v1002_v22 = vld [vmem:[%s2687_s17 + $0x38] sm:$0xff]  ;;  %1021 = vmatpush.msra.mxu0 %v998_v21  ;;  %v1001_v26 = vld [vmem:[%s2687_s17 + $0x30] sm:$0xff]  ;;  %v1000_v30 = vld [vmem:[%s2687_s17 + $0x28] sm:$0xff]  ;;  %vm1163_vm8 = vcmask 64512   ;;  %vm1238_vm9 = vcmask 130048   ;;  %s3199_s1 = sld [smem:[#allocation23_spill]] }
  0x50   : > { %s2422_s23 = sshll.u32 %s925_s11, 4  ;;  %v1058_v23 = vld [vmem:[%s2692_s21 + $0x18] sm:$0xff]  ;;  %1044 = vmatpush.msra.mxu1 %v1002_v22  ;;  %v1057_v27 = vld [vmem:[%s2692_s21 + $0x10] sm:$0xff]  ;;  %v1056_v31 = vld [vmem:[%s2692_s21 + $0x8] sm:$0xff]  ;;  %s3200_s6 = sld [smem:[#allocation24_spill]] }
  0x51   : > { %s928_s28 = scalar_lea.vmem %s3193_s5, %s2422_s23  ;;  %v1062_v24 = vld [vmem:[%s2692_s21 + $0x38] sm:$0xff]  ;;  %1075 = vmatpush.msra.mxu2 %v1058_v23  ;;  %1022 = vmatpush.msra.mxu0 %v997_v25  ;;  %v1061_v28 = vld [vmem:[%s2692_s21 + $0x30] sm:$0xff]  ;;  %v1060_v32 = vld [vmem:[%s2692_s21 + $0x28] sm:$0xff]  ;;  %s3201_s11 = sld [smem:[#allocation12_spill]] }
  0x52   : > { %v2875_v0 = vld [vmem:[%s928_s28] sm:$0xff]  ;;  %v2879_v2 = vld [vmem:[%s928_s28 + $0x8] sm:$0xff]  ;;  %1098 = vmatpush.msra.mxu3 %v1062_v24  ;;  %1045 = vmatpush.msra.mxu1 %v1001_v26  ;;  %v1112_v40 = vld [vmem:[%s2697_s25 + $0x18] sm:$0xff]  ;;  %s3202_s23 = sld [smem:[#allocation13_spill]] }
  0x53   : > { %v934_v1 = vsel %vm933_vm0, %v2875_v0, 0.0  ;;  %v937_v3 = vsel %vm933_vm0, %v2879_v2, 0.0  ;;  %1076 = vmatpush.msra.mxu2 %v1057_v27  ;;  %1023 = vmatpush.msra.mxu0 %v996_v29  ;;  %v995_v33 = vld [vmem:[%s2687_s17] sm:$0xff]  ;;  %v1116_v41 = vld [vmem:[%s2697_s25 + $0x38] sm:$0xff]  ;;  %v1111_v42 = vld [vmem:[%s2697_s25 + $0x10] sm:$0xff]  ;;  %s3203_s28 = sld [smem:[#allocation14_spill]] }
  0x54   : > { %935 = vadd.xlane.f32.xlu0 %v934_v1  ;;  %1099 = vmatpush.msra.mxu3 %v1061_v28  ;;  %v999_v34 = vld [vmem:[%s2687_s17 + $0x20] sm:$0xff]  ;;  %v1115_v43 = vld [vmem:[%s2697_s25 + $0x30] sm:$0xff]  ;;  %v1110_v45 = vld [vmem:[%s2697_s25 + $0x8] sm:$0xff]  ;;  %s3210_s5 = sld [smem:[#allocation19_spill]] }
  0x55   : > { %v2510_v5 = vpop.eup %2509  ;;  %1046 = vmatpush.msra.mxu1 %v1000_v30  ;;  %1077 = vmatpush.msra.mxu2 %v1056_v31  ;;  %v1055_v35 = vld [vmem:[%s2692_s21] sm:$0xff]  ;;  %v1114_v46 = vld [vmem:[%s2697_s25 + $0x28] sm:$0xff] }
  0x56   : > { %v941_v6 = vmul.f32 32.0, %v2510_v5  ;;  %vm945_vm1 = vweird.f32 %v2510_v5  ;;  %1100 = vmatpush.msra.mxu3 %v1060_v32  ;;  %1024 = vmatpush.msra.mxu0 %v995_v33  ;;  %v1059_v36 = vld [vmem:[%s2692_s21 + $0x20] sm:$0xff] }
  0x57   : > { %1047 = vmatpush.msra.mxu1 %v999_v34  ;;  %1078 = vmatpush.msra.mxu2 %v1055_v35  ;;  %v1109_v48 = vld [vmem:[%s2697_s25] sm:$0xff] }
  0x58   : > { %v942_v7 = vsub.f32 1.0, %v941_v6  ;;  %1101 = vmatpush.msra.mxu3 %v1059_v36  ;;  %1129 = vmatpush.msrb.mxu0 %v1112_v40  ;;  %v1113_v49 = vld [vmem:[%s2697_s25 + $0x20] sm:$0xff] }
  0x59   : > { %1152 = vmatpush.msrb.mxu1 %v1116_v41  ;;  %v2493_v59 = vld [vmem:[%s3194_s9] ss:$0 sm:$0xff] }
  0x5a   : > { %v943_v8 = vmul.f32 %v2510_v5, %v942_v7  ;;  %1130 = vmatpush.msrb.mxu0 %v1111_v42  ;;  %v2494_v62 = vld [vmem:[%s3195_s13] ss:$0 sm:$0xff] }
  0x5b   : > { %1153 = vmatpush.msrb.mxu1 %v1115_v43 }
  0x5c   : > { %938 = vadd.xlane.f32.xlu0 %v937_v3  ;;  %v944_v9 = vadd.f32 %v2510_v5, %v943_v8  ;;  %1131 = vmatpush.msrb.mxu0 %v1110_v45 }
  0x5d   : > { %1154 = vmatpush.msrb.mxu1 %v1114_v46 }
  0x5e   : > { %v2883_v10 = vsel %vm945_vm1, %v2510_v5, %v944_v9  ;;  %1132 = vmatpush.msrb.mxu0 %v1109_v48 }
  0x5f   : > { %1155 = vmatpush.msrb.mxu1 %v1113_v49 }
  0xc7   : > { %v936_v11 = vpop.xlane.xlu0 %935 }
  0xc8   : > { %v947_v12 = vmul.f32 %v2883_v10, %v936_v11 }
  0xca   : > { %v2887_v13 = vsub.f32 %v2875_v0, %v947_v12 }
  0xcc   : > { %v951_v14 = vmul.f32 %v2887_v13, %v2887_v13 }
  0xce   : > { %v953_v15 = vsel %vm933_vm0, %v951_v14, 0.0 }
  0xcf   : > { %954 = vadd.xlane.f32.xlu1 %v953_v15  ;;  %v939_v16 = vpop.xlane.xlu0 %938 }
  0xd0   : > { %v948_v17 = vmul.f32 %v2883_v10, %v939_v16 }
  0xd2   : > { %v2894_v18 = vsub.f32 %v2879_v2, %v948_v17 }
  0xd4   : > { %v952_v19 = vmul.f32 %v2894_v18, %v2894_v18 }
  0xd6   : > { %v956_v20 = vsel %vm933_vm0, %v952_v19, 0.0 }
  0xd7   : > { %957 = vadd.xlane.f32.xlu1 %v956_v20 }
 0x142   : > { %v955_v37 = vpop.xlane.xlu1 %954 }
 0x143   : > { %v959_v38 = vmul.f32 %v955_v37, %v2883_v10 }
 0x145   : > { %v961_v39 = vadd.f32 1e-05, %v959_v38 }
 0x147   : > { %2511 = vrsqrt.f32 %v961_v39  ;;  %vm969_vm3 = vweird.f32 %v961_v39 }
 0x14a   : > { %v958_v44 = vpop.xlane.xlu1 %957 }
 0x14b   : > { %v960_v47 = vmul.f32 %v958_v44, %v2883_v10 }
 0x14d   : > { %v2512_v50 = vpop.eup %2511  ;;  %v962_v51 = vadd.f32 1e-05, %v960_v47 }
 0x14e   : > { %v964_v52 = vmul.f32 %v2512_v50, %v961_v39  ;;  %vm970_vm2 = vweird.f32 %v2512_v50 }
 0x14f   : > { %2513 = vrsqrt.f32 %v962_v51  ;;  %vm971_vm4 = vmor %vm969_vm3, %vm970_vm2  ;;  %vm979_vm6 = vweird.f32 %v962_v51  ;;  %vm1580_vm2 = vcmask 523264  }
 0x150   : > { %v965_v53 = vmul.f32 %v2512_v50, %v964_v52 }
 0x152   : > { %v966_v54 = vmul.f32 0.5, %v965_v53 }
 0x154   : > { %v967_v55 = vsub.f32 1.5, %v966_v54 }
 0x155   : > { %v2514_v56 = vpop.eup %2513 }
 0x156   : > { %v968_v57 = vmul.f32 %v2512_v50, %v967_v55  ;;  %v974_v58 = vmul.f32 %v2514_v56, %v962_v51  ;;  %vm980_vm5 = vweird.f32 %v2514_v56 }
 0x157   : > { %vm981_vm7 = vmor %vm979_vm6, %vm980_vm5 }
 0x158   : > { %v972_v60 = vsel %vm971_vm4, %v2512_v50, %v968_v57  ;;  %v975_v61 = vmul.f32 %v2514_v56, %v974_v58 }
 0x159   : > { %v983_v63 = vmul.f32 %v972_v60, %v2887_v13 }
 0x15a   : > { %v976_v1 = vmul.f32 0.5, %v975_v61 }
 0x15b   : > { %v988_v3 = vmul.f32 %v2493_v59, %v983_v63 }
 0x15c   : > { %v977_v4 = vsub.f32 1.5, %v976_v1 }
 0x15d   : > { %v993_v5 = vadd.f32 %v2494_v62, %v988_v3 }
 0x15e   : > { %v978_v6 = vmul.f32 %v2514_v56, %v977_v4 }
 0x15f   : > { %2366 = vmatmul.msk.f32.vlgmr.msra.gmra.mxu0 %vm933_vm0, %v993_v5  ;;  %2368 = vmatmul.msk.f32.vlgmr.msra.gmra.mxu1 %vm933_vm0, %v993_v5 }
 0x160   : > { %v982_v7 = vsel %vm981_vm7, %v2514_v56, %v978_v6  ;;  %2370 = vmatmul.msk.f32.vlgmr.msra.gmra.mxu2 %vm933_vm0, %v993_v5  ;;  %2372 = vmatmul.msk.f32.vlgmr.msra.gmra.mxu3 %vm933_vm0, %v993_v5 }
 0x161   : > { %v984_v8 = vmul.f32 %v982_v7, %v2894_v18 }
 0x163   : > { %v989_v9 = vmul.f32 %v2493_v59, %v984_v8 }
 0x165   : > { %v994_v11 = vadd.f32 %v2494_v62, %v989_v9 }
 0x167   : > { %2367 = vmatmul.msk.f32.gmra.mxu0 %vm933_vm0, %v994_v11  ;;  %2369 = vmatmul.msk.f32.gmra.mxu1 %vm933_vm0, %v994_v11 }
 0x168   : > { %2371 = vmatmul.msk.f32.gmra.mxu2 %vm933_vm0, %v994_v11  ;;  %2373 = vmatmul.msk.f32.gmra.mxu3 %vm933_vm0, %v994_v11 }
 0x16f   : > { %2374 = vmatmul.msk.f32.vlgmr.msrb.gmra.mxu0 %vm933_vm0, %v993_v5  ;;  %2376 = vmatmul.msk.f32.vlgmr.msrb.gmra.mxu1 %vm933_vm0, %v993_v5 }
 0x177   : > { %2375 = vmatmul.msk.f32.gmra.mxu0 %vm933_vm0, %v994_v11  ;;  %2377 = vmatmul.msk.f32.gmra.mxu1 %vm933_vm0, %v994_v11 }
 0x1dc   : > { %v1026_v12 = vpop.f32.mrf.mxu0  ;;  %v1049_v13 = vpop.f32.mrf.mxu1 }
 0x1e3   : > { %v1080_v14 = vpop.f32.mrf.mxu2  ;;  %v1103_v15 = vpop.f32.mrf.mxu3 }
 0x1e4   : > { %v1029_v16 = vpop.f32.mrf.mxu0  ;;  %v1052_v17 = vpop.f32.mrf.mxu1 }
 0x1eb   : > { %v1083_v18 = vpop.f32.mrf.mxu2  ;;  %v1106_v19 = vpop.f32.mrf.mxu3 }
 0x1ec   : > { %2378 = vmatpush.xpose.msk.msrb.mxu2 %vm1163_vm8, %v1083_v18  ;;  %2382 = vmatpush.xpose.msk.msrb.mxu3 %vm1163_vm8, %v1106_v19  ;;  %v1134_v20 = vpop.f32.mrf.mxu0  ;;  %v1157_v21 = vpop.f32.mrf.mxu1  ;;  %v1353_v19 = vld [vmem:[%s2702_s29] sm:$0xff] }
 0x1f0   : > { %2379 = vmatpush.xpose.msk.msrb.mxu2 %vm1163_vm8, %v1080_v14  ;;  %2383 = vmatpush.xpose.msk.msrb.mxu3 %vm1163_vm8, %v1103_v15 }
 0x1f3   : > { %2380 = vmatmul.msk.f32.vlgmr.msrb.gmra.mxu2 %vm1163_vm8, %v1026_v12  ;;  %2384 = vmatmul.msk.f32.vlgmr.msrb.gmra.mxu3 %vm1163_vm8, %v1049_v13 }
 0x1f4   : > { %v1137_v22 = vpop.f32.mrf.mxu0  ;;  %v1160_v23 = vpop.f32.mrf.mxu1  ;;  %1376 = vmatpush.msra.mxu2 %v1353_v19 }
 0x1f5   : > { %1315 = vmatpush.msra.mxu0 %v1137_v22  ;;  %1344 = vmatpush.msra.mxu1 %v1160_v23 }
 0x1f7   : > { %1316 = vmatpush.msra.mxu0 %v1134_v20  ;;  %1345 = vmatpush.msra.mxu1 %v1157_v21  ;;  %v1354_v20 = vld [vmem:[%s2702_s29 + $0x8] sm:$0xff] }
 0x1f8   : > { %1405 = vmatpush.msra.mxu3 %v1354_v20  ;;  %v1575_v20 = vld [vmem:[%s2727_s24 + $0x38] sm:$0xff] }
 0x1f9   : > { %1595 = vmatpush.msrb.mxu1 %v1575_v20 }
 0x1fb   : > { %2381 = vmatmul.msk.f32.gmra.mxu2 %vm1163_vm8, %v1029_v16  ;;  %2385 = vmatmul.msk.f32.gmra.mxu3 %vm1163_vm8, %v1052_v17 }
 0x276   : > { %v1193_v24 = vpop.f32.mrf.mxu2  ;;  %v1228_v25 = vpop.f32.mrf.mxu3 }
 0x277   : > { %v1234_v26 = vmul.f32 0.35355338, %v1193_v24  ;;  %v1236_v28 = vmul.f32 0.35355338, %v1228_v25 }
 0x279   : > { %v1239_v27 = vsel %vm1238_vm9, %v1234_v26, -inf  ;;  %v1245_v33 = vsel %vm1238_vm9, %v1236_v28, -inf }
 0x27a   : > { %1240 = vmax.xlane.f32.xlu2 %v1239_v27 }
 0x27e   : > { %v1196_v29 = vpop.f32.mrf.mxu2  ;;  %v1231_v30 = vpop.f32.mrf.mxu3 }
 0x27f   : > { %v1235_v31 = vmul.f32 0.35355338, %v1196_v29  ;;  %v1237_v32 = vmul.f32 0.35355338, %v1231_v30 }
 0x281   : > { %v1248_v34 = vsel %vm1238_vm9, %v1237_v32, -inf  ;;  %v1242_v35 = vsel %vm1238_vm9, %v1235_v31, -inf }
 0x282   : > { %1246 = vmax.xlane.f32.xlu2 %v1245_v33  ;;  %1249 = vmax.xlane.f32.xlu1 %v1248_v34 }
 0x283   : > { %1243 = vmax.xlane.f32.xlu0 %v1242_v35 }
 0x2ed   : > { %v1241_v36 = vpop.xlane.xlu2 %1240 }
 0x2ee   : > { %v1251_v37 = vsub.f32 %v1234_v26, %v1241_v36 }
 0x2f0   : > { %v1255_v38 = vmul.f32 1.442695, %v1251_v37 }
 0x2f2   : > { %2515 = vpow2.f32 %v1255_v38 }
 0x2f5   : > { %v1247_v39 = vpop.xlane.xlu2 %1246  ;;  %v1250_v40 = vpop.xlane.xlu1 %1249 }
 0x2f6   : > { %v1253_v41 = vsub.f32 %v1236_v28, %v1247_v39  ;;  %v1254_v42 = vsub.f32 %v1237_v32, %v1250_v40  ;;  %v1244_v43 = vpop.xlane.xlu0 %1243 }
 0x2f7   : > { %v1252_v44 = vsub.f32 %v1235_v31, %v1244_v43  ;;  %v1476_v43 = vld [vmem:[%s2717_s14 + $0x18] sm:$0xff] }
 0x2f8   : > { %v2516_v45 = vpop.eup %2515  ;;  %v1259_v46 = vmul.f32 1.442695, %v1253_v41  ;;  %v1261_v47 = vmul.f32 1.442695, %v1254_v42  ;;  %1499 = vmatpush.msrb.mxu0 %v1476_v43 }
 0x2f9   : > { %v1257_v48 = vmul.f32 1.442695, %v1252_v44  ;;  %v1263_v49 = vsel %vm1238_vm9, %v2516_v45, 0.0  ;;  %v1475_v44 = vld [vmem:[%s2717_s14 + $0x10] sm:$0xff] }
 0x2fa   : > { %2517 = vpow2.f32 %v1259_v46  ;;  %1264 = vadd.xlane.f32.xlu2 %v1263_v49  ;;  %1500 = vmatpush.msrb.mxu0 %v1475_v44  ;;  %v1473_v46 = vld [vmem:[%s2717_s14] sm:$0xff] }
 0x2fb   : > { %2519 = vpow2.f32 %v1261_v47 }
 0x2fc   : > { %2521 = vpow2.f32 %v1257_v48 }
 0x300   : > { %v2518_v50 = vpop.eup %2517 }
 0x301   : > { %v2520_v51 = vpop.eup %2519  ;;  %v1269_v52 = vsel %vm1238_vm9, %v2518_v50, 0.0 }
 0x302   : > { %v2522_v53 = vpop.eup %2521  ;;  %v1272_v54 = vsel %vm1238_vm9, %v2520_v51, 0.0  ;;  %1270 = vadd.xlane.f32.xlu0 %v1269_v52 }
 0x303   : > { %1273 = vadd.xlane.f32.xlu2 %v1272_v54  ;;  %v1266_v55 = vsel %vm1238_vm9, %v2522_v53, 0.0 }
 0x304   : > { %1267 = vadd.xlane.f32.xlu1 %v1266_v55 }
 0x36d   : > { %v1265_v56 = vpop.xlane.xlu2 %1264 }
 0x36e   : > { %2523 = vrcp.f32 %v1265_v56 }
 0x374   : > { %v2524_v57 = vpop.eup %2523 }
 0x375   : > { %v1279_v58 = vmul.f32 %v2524_v57, %v1265_v56  ;;  %v1271_v59 = vpop.xlane.xlu0 %1270 }
 0x376   : > { %v1274_v60 = vpop.xlane.xlu2 %1273  ;;  %2525 = vrcp.f32 %v1271_v59 }
 0x377   : > { %v1283_v61 = vsub.f32 2.0, %v1279_v58  ;;  %2527 = vrcp.f32 %v1274_v60  ;;  %v1268_v62 = vpop.xlane.xlu1 %1267 }
 0x378   : > { %2529 = vrcp.f32 %v1268_v62 }
 0x379   : > { %v1287_v63 = vmul.f32 %v2524_v57, %v1283_v61  ;;  %v2495_v61 = vld [vmem:[%s3196_s3] ss:$0 sm:$0xff]  ;;  %s3205_s3 = sld [smem:[#allocation11_spill]] }
 0x37b   : > { %v1291_v1 = vmul.f32 %v2516_v45, %v1287_v63  ;;  %v1474_v45 = vld [vmem:[%s2717_s14 + $0x8] sm:$0xff] }
 0x37c   : > { %v2526_v3 = vpop.eup %2525  ;;  %1501 = vmatpush.msrb.mxu0 %v1474_v45 }
 0x37d   : > { %v2528_v4 = vpop.eup %2527  ;;  %v1281_v5 = vmul.f32 %v2526_v3, %v1271_v59  ;;  %2386 = vmatmul.msk.f32.vlgmr.msra.gmra.mxu0 %vm1238_vm9, %v1291_v1 }
 0x37e   : > { %v2530_v6 = vpop.eup %2529  ;;  %v1282_v7 = vmul.f32 %v2528_v4, %v1274_v60  ;;  %1502 = vmatpush.msrb.mxu0 %v1473_v46 }
 0x37f   : > { %v1280_v8 = vmul.f32 %v2530_v6, %v1268_v62  ;;  %v1285_v9 = vsub.f32 2.0, %v1281_v5 }
 0x380   : > { %v1286_v13 = vsub.f32 2.0, %v1282_v7 }
 0x381   : > { %v1284_v11 = vsub.f32 2.0, %v1280_v8  ;;  %v1289_v12 = vmul.f32 %v2526_v3, %v1285_v9  ;;  %v2496_v3 = vld [vmem:[%s3197_s8] ss:$0 sm:$0xff] }
 0x382   : > { %v1290_v17 = vmul.f32 %v2528_v4, %v1286_v13 }
 0x383   : > { %v1288_v14 = vmul.f32 %v2530_v6, %v1284_v11  ;;  %v1293_v15 = vmul.f32 %v2518_v50, %v1289_v12 }
 0x384   : > { %v1294_v18 = vmul.f32 %v2520_v51, %v1290_v17 }
 0x385   : > { %v1292_v16 = vmul.f32 %v2522_v53, %v1288_v14  ;;  %2388 = vmatmul.msk.f32.vlgmr.msra.gmra.mxu1 %vm1238_vm9, %v1293_v15  ;;  %v2497_v14 = vld [vmem:[%s2722_s19] ss:$0 sm:$0xff] }
 0x387   : > { %2387 = vmatmul.msk.f32.gmra.mxu0 %vm1238_vm9, %v1292_v16 }
 0x38d   : > { %2389 = vmatmul.msk.f32.gmra.mxu1 %vm1238_vm9, %v1294_v18 }
 0x3fa   : > { %v1318_v21 = vpop.f32.mrf.mxu0 }
 0x3fb   : > { %2390 = vmatmul.msk.f32.vlgmr.msra.gmra.mxu2 %vm1163_vm8, %v1318_v21 }
 0x402   : > { %v1347_v22 = vpop.f32.mrf.mxu1 }
 0x403   : > { %2392 = vmatmul.msk.f32.vlgmr.msra.gmra.mxu3 %vm1163_vm8, %v1347_v22 }
 0x404   : > { %v1321_v23 = vpop.f32.mrf.mxu0 }
 0x405   : > { %2391 = vmatmul.msk.f32.gmra.mxu2 %vm1163_vm8, %v1321_v23 }
 0x40a   : > { %v1350_v24 = vpop.f32.mrf.mxu1 }
 0x40b   : > { %2393 = vmatmul.msk.f32.gmra.mxu3 %vm1163_vm8, %v1350_v24  ;;  %v1574_v24 = vld [vmem:[%s2727_s24 + $0x30] sm:$0xff] }
 0x40c   : > { %1596 = vmatpush.msrb.mxu1 %v1574_v24  ;;  %v2498_v24 = vld [vmem:[%s2732_s30] ss:$0 sm:$0xff] }
 0x47e   : > { %v1378_v25 = vpop.f32.mrf.mxu2 }
 0x486   : > { %v1407_v26 = vpop.f32.mrf.mxu3 }
 0x487   : > { %v1413_v27 = vadd.f32 %v1407_v26, %v1378_v25  ;;  %v1573_v26 = vld [vmem:[%s2727_s24 + $0x28] sm:$0xff] }
 0x488   : > { %v1381_v30 = vpop.f32.mrf.mxu2  ;;  %1597 = vmatpush.msrb.mxu1 %v1573_v26 }
 0x489   : > { %v2968_v28 = vadd.f32 %v1413_v27, %v2875_v0 }
 0x48b   : > { %v1419_v29 = vsel %vm933_vm0, %v2968_v28, 0.0 }
 0x48c   : > { %1420 = vadd.xlane.f32.xlu0 %v1419_v29  ;;  %v1572_v29 = vld [vmem:[%s2727_s24 + $0x20] sm:$0xff] }
 0x48d   : > { %1598 = vmatpush.msrb.mxu1 %v1572_v29 }
 0x48e   : > { %v1410_v31 = vpop.f32.mrf.mxu3 }
 0x48f   : > { %v1414_v32 = vadd.f32 %v1410_v31, %v1381_v30  ;;  %v1571_v31 = vld [vmem:[%s2727_s24 + $0x18] sm:$0xff] }
 0x490   : > { %1599 = vmatpush.msrb.mxu1 %v1571_v31 }
 0x491   : > { %v2973_v33 = vadd.f32 %v1414_v32, %v2879_v2 }
 0x493   : > { %v1422_v34 = vsel %vm933_vm0, %v2973_v33, 0.0 }
 0x494   : > { %1423 = vadd.xlane.f32.xlu1 %v1422_v34 }
 0x4ff   : > { %v1421_v35 = vpop.xlane.xlu0 %1420 }
 0x500   : > { %v1425_v0 = vmul.f32 %v1421_v35, %v2883_v10  ;;  %v1570_v35 = vld [vmem:[%s2727_s24 + $0x10] sm:$0xff] }
 0x501   : > { %1600 = vmatpush.msrb.mxu1 %v1570_v35 }
 0x502   : > { %v1427_v36 = vsub.f32 %v2968_v28, %v1425_v0 }
 0x504   : > { %v1429_v37 = vmul.f32 %v1427_v36, %v1427_v36 }
 0x506   : > { %v1431_v38 = vsel %vm933_vm0, %v1429_v37, 0.0  ;;  %v1568_v37 = vld [vmem:[%s2727_s24] sm:$0xff] }
 0x507   : > { %1432 = vadd.xlane.f32.xlu2 %v1431_v38  ;;  %v1424_v39 = vpop.xlane.xlu1 %1423 }
 0x508   : > { %v1426_v2 = vmul.f32 %v1424_v39, %v2883_v10 }
 0x50a   : > { %v1428_v40 = vsub.f32 %v2973_v33, %v1426_v2 }
 0x50c   : > { %v1430_v41 = vmul.f32 %v1428_v40, %v1428_v40 }
 0x50e   : > { %v1434_v42 = vsel %vm933_vm0, %v1430_v41, 0.0 }
 0x50f   : > { %1435 = vadd.xlane.f32.xlu0 %v1434_v42 }
 0x57a   : > { %v1433_v47 = vpop.xlane.xlu2 %1432 }
 0x57b   : > { %v1437_v48 = vmul.f32 %v1433_v47, %v2883_v10 }
 0x57d   : > { %v1439_v49 = vadd.f32 1e-05, %v1437_v48 }
 0x57f   : > { %2531 = vrsqrt.f32 %v1439_v49  ;;  %vm1447_vm11 = vweird.f32 %v1439_v49 }
 0x582   : > { %v1436_v50 = vpop.xlane.xlu0 %1435 }
 0x583   : > { %v1438_v51 = vmul.f32 %v1436_v50, %v2883_v10 }
 0x585   : > { %v2532_v52 = vpop.eup %2531  ;;  %v1440_v53 = vadd.f32 1e-05, %v1438_v51 }
 0x586   : > { %v1442_v54 = vmul.f32 %v2532_v52, %v1439_v49  ;;  %vm1448_vm10 = vweird.f32 %v2532_v52 }
 0x587   : > { %2533 = vrsqrt.f32 %v1440_v53  ;;  %vm1449_vm12 = vmor %vm1447_vm11, %vm1448_vm10  ;;  %vm1457_vm14 = vweird.f32 %v1440_v53 }
 0x588   : > { %v1443_v55 = vmul.f32 %v2532_v52, %v1442_v54 }
 0x58a   : > { %v1444_v56 = vmul.f32 0.5, %v1443_v55 }
 0x58c   : > { %v1445_v57 = vsub.f32 1.5, %v1444_v56 }
 0x58d   : > { %v2534_v58 = vpop.eup %2533 }
 0x58e   : > { %v1446_v59 = vmul.f32 %v2532_v52, %v1445_v57  ;;  %v1452_v60 = vmul.f32 %v2534_v58, %v1440_v53  ;;  %vm1458_vm13 = vweird.f32 %v2534_v58 }
 0x58f   : > { %vm1459_vm15 = vmor %vm1457_vm14, %vm1458_vm13 }
 0x590   : > { %v1450_v62 = vsel %vm1449_vm12, %v2532_v52, %v1446_v59  ;;  %v1453_v63 = vmul.f32 %v2534_v58, %v1452_v60 }
 0x591   : > { %v1461_v1 = vmul.f32 %v1450_v62, %v1427_v36  ;;  %v1569_v36 = vld [vmem:[%s2727_s24 + $0x8] sm:$0xff] }
 0x592   : > { %v1454_v4 = vmul.f32 0.5, %v1453_v63  ;;  %1601 = vmatpush.msrb.mxu1 %v1569_v36 }
 0x593   : > { %v1466_v5 = vmul.f32 %v2495_v61, %v1461_v1 }
 0x594   : > { %v1455_v6 = vsub.f32 1.5, %v1454_v4  ;;  %1602 = vmatpush.msrb.mxu1 %v1568_v37 }
 0x595   : > { %v1471_v7 = vadd.f32 %v2496_v3, %v1466_v5 }
 0x596   : > { %v1456_v8 = vmul.f32 %v2534_v58, %v1455_v6 }
 0x597   : > { %2394 = vmatmul.msk.f32.vlgmr.msrb.gmra.mxu0 %vm933_vm0, %v1471_v7 }
 0x598   : > { %v1460_v9 = vsel %vm1459_vm15, %v2534_v58, %v1456_v8 }
 0x599   : > { %v1462_v11 = vmul.f32 %v1460_v9, %v1428_v40 }
 0x59b   : > { %v1467_v12 = vmul.f32 %v2495_v61, %v1462_v11 }
 0x59d   : > { %v1472_v13 = vadd.f32 %v2496_v3, %v1467_v12 }
 0x59f   : > { %2395 = vmatmul.msk.f32.gmra.mxu0 %vm933_vm0, %v1472_v13 }
 0x614   : > { %v1504_v15 = vpop.f32.mrf.mxu0 }
 0x615   : > { %v2994_v16 = vadd.f32 %v2497_v14, %v1504_v15 }
 0x617   : > { %v2997_v17 = vmul.f32 0.70710677, %v2994_v16  ;;  %v1510_v12 = vmul.f32 0.5, %v2994_v16 }
 0x619   : > { %v1514_v18 = vand.u32 2147483647, %v2997_v17  ;;  %vm1558_vm1 = vcmp.ge.f32.partialorder %v2997_v17, 0.0 }
 0x61b   : > { %v1516_v19 = vmul.f32 0.3275911, %v1514_v18  ;;  %v1546_v2 = vsub.f32 0.0, %v1514_v18 }
 0x61c   : > { %v1507_v21 = vpop.f32.mrf.mxu0 }
 0x61d   : > { %v1518_v22 = vadd.f32 1.0, %v1516_v19  ;;  %v3001_v23 = vadd.f32 %v2497_v14, %v1507_v21  ;;  %v1548_v44 = vmul.f32 %v1546_v2, %v1514_v18 }
 0x61f   : > { %2535 = vrcp.f32 %v1518_v22  ;;  %v3005_v25 = vmul.f32 0.70710677, %v3001_v23  ;;  %v1550_v49 = vmul.f32 1.442695, %v1548_v44  ;;  %v1511_v21 = vmul.f32 0.5, %v3001_v23 }
 0x621   : > { %v1515_v27 = vand.u32 2147483647, %v3005_v25  ;;  %vm1559_vm3 = vcmp.ge.f32.partialorder %v3005_v25, 0.0 }
 0x623   : > { %v1517_v30 = vmul.f32 0.3275911, %v1515_v27  ;;  %v1547_v50 = vsub.f32 0.0, %v1515_v27 }
 0x625   : > { %v2536_v32 = vpop.eup %2535  ;;  %v1519_v34 = vadd.f32 1.0, %v1517_v30  ;;  %v1549_v55 = vmul.f32 %v1547_v50, %v1515_v27 }
 0x626   : > { %v1522_v0 = vmul.f32 %v2536_v32, %v1518_v22 }
 0x627   : > { %2537 = vrcp.f32 %v1519_v34  ;;  %v1552_v60 = vmul.f32 1.442695, %v1549_v55 }
 0x628   : > { %v1524_v38 = vsub.f32 2.0, %v1522_v0  ;;  %2539 = vpow2.f32 %v1550_v49 }
 0x629   : > { %2541 = vpow2.f32 %v1552_v60 }
 0x62a   : > { %v1526_v39 = vmul.f32 %v2536_v32, %v1524_v38 }
 0x62c   : > { %v1528_v40 = vmul.f32 1.0614054, %v1526_v39 }
 0x62d   : > { %v2538_v41 = vpop.eup %2537 }
 0x62e   : > { %v1530_v42 = vadd.f32 -1.4531521, %v1528_v40  ;;  %v1523_v43 = vmul.f32 %v2538_v41, %v1519_v34  ;;  %v2540_v63 = vpop.eup %2539 }
 0x62f   : > { %v2542_v11 = vpop.eup %2541 }
 0x630   : > { %v1532_v45 = vmul.f32 %v1530_v42, %v1526_v39  ;;  %v1525_v46 = vsub.f32 2.0, %v1523_v43 }
 0x632   : > { %v1534_v47 = vadd.f32 1.4214138, %v1532_v45  ;;  %v1527_v48 = vmul.f32 %v2538_v41, %v1525_v46 }
 0x634   : > { %v1536_v51 = vmul.f32 %v1534_v47, %v1526_v39  ;;  %v1529_v52 = vmul.f32 1.0614054, %v1527_v48 }
 0x636   : > { %v1538_v53 = vadd.f32 -0.28449672, %v1536_v51  ;;  %v1531_v54 = vadd.f32 -1.4531521, %v1529_v52 }
 0x638   : > { %v1540_v56 = vmul.f32 %v1538_v53, %v1526_v39  ;;  %v1533_v57 = vmul.f32 %v1531_v54, %v1527_v48 }
 0x63a   : > { %v1542_v58 = vadd.f32 0.2548296, %v1540_v56  ;;  %v1535_v59 = vadd.f32 1.4214138, %v1533_v57 }
 0x63c   : > { %v1544_v61 = vmul.f32 %v1542_v58, %v1526_v39  ;;  %v1537_v62 = vmul.f32 %v1535_v59, %v1527_v48  ;;  %v2499_v58 = vld [vmem:[%s3198_s4] ss:$0 sm:$0xff]  ;;  %s3209_s4 = sld [smem:[#allocation17_spill]] }
 0x63e   : > { %v1554_v1 = vmul.f32 %v2540_v63, %v1544_v61  ;;  %v1539_v3 = vadd.f32 -0.28449672, %v1537_v62  ;;  %v2500_v63 = vld [vmem:[%s3199_s1] ss:$0 sm:$0xff]  ;;  %s3204_s1 = sld [smem:[#allocation10_spill]] }
 0x640   : > { %v1556_v4 = vsub.f32 1.0, %v1554_v1  ;;  %v1541_v5 = vmul.f32 %v1539_v3, %v1527_v48 }
 0x642   : > { %v1560_v6 = vsub.f32 0.0, %v1556_v4  ;;  %v1543_v7 = vadd.f32 0.2548296, %v1541_v5  ;;  %v1668_v5 = vld [vmem:[%s3200_s6] sm:$0xff]  ;;  %s3211_s6 = sld [smem:[#allocation20_spill]] }
 0x644   : > { %v1562_v8 = vsel %vm1558_vm1, %v1556_v4, %v1560_v6  ;;  %v1545_v9 = vmul.f32 %v1543_v7, %v1527_v48 }
 0x645   : > { %v1564_v13 = vadd.f32 1.0, %v1562_v8 }
 0x646   : > { %v1555_v14 = vmul.f32 %v2542_v11, %v1545_v9 }
 0x647   : > { %v1566_v15 = vmul.f32 %v1564_v13, %v1510_v12 }
 0x648   : > { %v1557_v18 = vsub.f32 1.0, %v1555_v14 }
 0x649   : > { %2396 = vmatmul.msk.f32.vlgmr.msrb.gmra.mxu1 %vm1580_vm2, %v1566_v15 }
 0x64a   : > { %v1561_v19 = vsub.f32 0.0, %v1557_v18 }
 0x64c   : > { %v1563_v20 = vsel %vm1559_vm3, %v1557_v18, %v1561_v19 }
 0x64d   : > { %v1565_v17 = vadd.f32 1.0, %v1563_v20 }
 0x64f   : > { %v1567_v22 = vmul.f32 %v1565_v17, %v1511_v21 }
 0x651   : > { %2397 = vmatmul.msk.f32.gmra.mxu1 %vm1580_vm2, %v1567_v22 }
 0x6c6   : > { %v1604_v26 = vpop.f32.mrf.mxu1 }
 0x6c7   : > { %v1605_v16 = vadd.f32 %v2498_v24, %v1604_v26 }
 0x6c9   : > { %v1610_v27 = vadd.f32 %v1605_v16, %v2968_v28 }
 0x6cb   : > { %v1614_v29 = vsel %vm933_vm0, %v1610_v27, 0.0 }
 0x6cc   : > { %1615 = vadd.xlane.f32.xlu2 %v1614_v29 }
 0x6ce   : > { %v1607_v30 = vpop.f32.mrf.mxu1 }
 0x6cf   : > { %v1608_v31 = vadd.f32 %v2498_v24, %v1607_v30 }
 0x6d1   : > { %v1611_v32 = vadd.f32 %v1608_v31, %v2973_v33  ;;  %v1771_v31 = vld [vmem:[%s3201_s11 + $0x18] sm:$0xff] }
 0x6d3   : > { %v1617_v25 = vsel %vm933_vm0, %v1611_v32, 0.0 }
 0x6d4   : > { %1618 = vadd.xlane.f32.xlu1 %v1617_v25  ;;  %v1822_v25 = vld [vmem:[%s3202_s23 + $0x18] sm:$0xff] }
 0x6d5   : > { %1839 = vmatpush.msra.mxu0 %v1822_v25 }
 0x73f   : > { %v1616_v23 = vpop.xlane.xlu2 %1615 }
 0x740   : > { %v1620_v34 = vmul.f32 %v1616_v23, %v2883_v10  ;;  %v1826_v23 = vld [vmem:[%s3202_s23 + $0x38] sm:$0xff] }
 0x741   : > { %1859 = vmatpush.msra.mxu1 %v1826_v23 }
 0x742   : > { %v1622_v35 = vsub.f32 %v1610_v27, %v1620_v34  ;;  %v1770_v34 = vld [vmem:[%s3201_s11 + $0x10] sm:$0xff] }
 0x744   : > { %v1624_v0 = vmul.f32 %v1622_v35, %v1622_v35 }
 0x746   : > { %v1626_v36 = vsel %vm933_vm0, %v1624_v0, 0.0  ;;  %v1821_v0 = vld [vmem:[%s3202_s23 + $0x10] sm:$0xff] }
 0x747   : > { %1627 = vadd.xlane.f32.xlu1 %v1626_v36  ;;  %v1619_v37 = vpop.xlane.xlu1 %1618  ;;  %v1825_v36 = vld [vmem:[%s3202_s23 + $0x30] sm:$0xff]  ;;  %1840 = vmatpush.msra.mxu0 %v1821_v0 }
 0x748   : > { %v1621_v28 = vmul.f32 %v1619_v37, %v2883_v10  ;;  %1860 = vmatpush.msra.mxu1 %v1825_v36  ;;  %v1769_v37 = vld [vmem:[%s3201_s11 + $0x8] sm:$0xff] }
 0x74a   : > { %v1623_v38 = vsub.f32 %v1611_v32, %v1621_v28  ;;  %v1775_v32 = vld [vmem:[%s3201_s11 + $0x38] sm:$0xff]  ;;  %v1773_v28 = vld [vmem:[%s3201_s11 + $0x28] sm:$0xff] }
 0x74c   : > { %v1625_v39 = vmul.f32 %v1623_v38, %v1623_v38 }
 0x74e   : > { %v1629_v2 = vsel %vm933_vm0, %v1625_v39, 0.0  ;;  %v1824_v39 = vld [vmem:[%s3202_s23 + $0x28] sm:$0xff] }
 0x74f   : > { %1630 = vadd.xlane.f32.xlu0 %v1629_v2  ;;  %v1768_v2 = vld [vmem:[%s3201_s11] sm:$0xff]  ;;  %1861 = vmatpush.msra.mxu1 %v1824_v39 }
 0x7ba   : > { %v1628_v33 = vpop.xlane.xlu1 %1627 }
 0x7bb   : > { %v1632_v40 = vmul.f32 %v1628_v33, %v2883_v10  ;;  %v1772_v33 = vld [vmem:[%s3201_s11 + $0x20] sm:$0xff] }
 0x7bd   : > { %v1634_v41 = vadd.f32 1e-05, %v1632_v40  ;;  %v1819_v40 = vld [vmem:[%s3202_s23] sm:$0xff] }
 0x7bf   : > { %2543 = vrsqrt.f32 %v1634_v41  ;;  %vm1642_vm5 = vweird.f32 %v1634_v41 }
 0x7c2   : > { %v1631_v42 = vpop.xlane.xlu0 %1630 }
 0x7c3   : > { %v1633_v43 = vmul.f32 %v1631_v42, %v2883_v10  ;;  %v1870_v42 = vld [vmem:[%s3203_s28 + $0x18] sm:$0xff] }
 0x7c5   : > { %v2544_v44 = vpop.eup %2543  ;;  %v1635_v45 = vadd.f32 1e-05, %v1633_v43  ;;  %v1874_v43 = vld [vmem:[%s3203_s28 + $0x38] sm:$0xff] }
 0x7c6   : > { %v1637_v46 = vmul.f32 %v2544_v44, %v1634_v41  ;;  %vm1643_vm4 = vweird.f32 %v2544_v44  ;;  %v1823_v41 = vld [vmem:[%s3202_s23 + $0x20] sm:$0xff] }
 0x7c7   : > { %2545 = vrsqrt.f32 %v1635_v45  ;;  %vm1644_vm6 = vmor %vm1642_vm5, %vm1643_vm4  ;;  %vm1652_vm10 = vweird.f32 %v1635_v45  ;;  %1862 = vmatpush.msra.mxu1 %v1823_v41 }
 0x7c8   : > { %v1638_v47 = vmul.f32 %v2544_v44, %v1637_v46 }
 0x7ca   : > { %v1639_v48 = vmul.f32 0.5, %v1638_v47 }
 0x7cc   : > { %v1640_v49 = vsub.f32 1.5, %v1639_v48  ;;  %v1868_v48 = vld [vmem:[%s3203_s28 + $0x8] sm:$0xff] }
 0x7cd   : > { %v2546_v50 = vpop.eup %2545 }
 0x7ce   : > { %v1647_v51 = vmul.f32 %v2546_v50, %v1635_v45  ;;  %v1641_v52 = vmul.f32 %v2544_v44, %v1640_v49  ;;  %vm1653_vm7 = vweird.f32 %v2546_v50  ;;  %v1873_v45 = vld [vmem:[%s3203_s28 + $0x30] sm:$0xff]  ;;  %v1872_v49 = vld [vmem:[%s3203_s28 + $0x28] sm:$0xff] }
 0x7cf   : > { %vm1654_vm11 = vmor %vm1652_vm10, %vm1653_vm7 }
 0x7d0   : > { %v1648_v53 = vmul.f32 %v2546_v50, %v1647_v51  ;;  %v1645_v55 = vsel %vm1644_vm6, %v2544_v44, %v1641_v52  ;;  %v1869_v44 = vld [vmem:[%s3203_s28 + $0x10] sm:$0xff]  ;;  %v1867_v51 = vld [vmem:[%s3203_s28] sm:$0xff] }
 0x7d1   : > { %v1656_v59 = vmul.f32 %v1645_v55, %v1622_v35  ;;  %v1774_v35 = vld [vmem:[%s3201_s11 + $0x30] sm:$0xff]  ;;  %v1871_v52 = vld [vmem:[%s3203_s28 + $0x20] sm:$0xff] }
 0x7d2   : > { %v1649_v54 = vmul.f32 0.5, %v1648_v53 }
 0x7d3   : > { %v1661_v1 = vmul.f32 %v2499_v58, %v1656_v59  ;;  %v2501_v59 = vld [vmem:[%s3204_s1] ss:$0 sm:$0xff]  ;;  %s3207_s1 = sld [smem:[#allocation18_spill]] }
 0x7d4   : > { %v1650_v56 = vsub.f32 1.5, %v1649_v54 }
 0x7d5   : > { %v1666_v4 = vadd.f32 %v2500_v63, %v1661_v1 }
 0x7d6   : > { %v1651_v57 = vmul.f32 %v2546_v50, %v1650_v56 }
 0x7d8   : > { %v1655_v60 = vsel %vm1654_vm11, %v2546_v50, %v1651_v57 }
 0x7d9   : > { %v1657_v61 = vmul.f32 %v1655_v60, %v1623_v38  ;;  %v1820_v38 = vld [vmem:[%s3202_s23 + $0x8] sm:$0xff] }
 0x7da   : > { %1841 = vmatpush.msra.mxu0 %v1820_v38 }
 0x7db   : > { %v1662_v62 = vmul.f32 %v2499_v58, %v1657_v61  ;;  %v2502_v61 = vld [vmem:[%s3205_s3] ss:$0 sm:$0xff]  ;;  %s3206_s3 = sld [smem:[#allocation15_spill]] }
 0x7dc   : > { %1842 = vmatpush.msra.mxu0 %v1819_v40 }
 0x7dd   : > { %v1667_v3 = vadd.f32 %v2500_v63, %v1662_v62 }
 0x7df   : > { %2398 = vmatpush.xpose.msk.msrb.mxu2 %vm933_vm0, %v1667_v3  ;;  %1730 = vmatpush.msrb.mxu3 %v1667_v3 }
 0x7e1   : > { %1731 = vmatpush.msrb.mxu3 %v1666_v4  ;;  %v2043_v39 = vld [vmem:[%s3206_s3] sm:$0xff] }
 0x7e3   : > { %2399 = vmatpush.xpose.msk.msrb.mxu2 %vm933_vm0, %v1666_v4  ;;  %1811 = vmatpush.msra.mxu3 %v1775_v32 }
 0x7e5   : > { %1812 = vmatpush.msra.mxu3 %v1774_v35 }
 0x7e6   : > { %2400 = vmatmul.msk.f32.vlgmr.msrb.gmra.mxu2 %vm933_vm0, %v1668_v5 }
 0x7e7   : > { %1791 = vmatpush.msra.mxu2 %v1771_v31  ;;  %1813 = vmatpush.msra.mxu3 %v1773_v28 }
 0x7e9   : > { %1792 = vmatpush.msra.mxu2 %v1770_v34  ;;  %1814 = vmatpush.msra.mxu3 %v1772_v33 }
 0x7eb   : > { %1793 = vmatpush.msra.mxu2 %v1769_v37 }
 0x7ed   : > { %1794 = vmatpush.msra.mxu2 %v1768_v2  ;;  %v2044_v2 = vld [vmem:[%s3206_s3 + $0x8] sm:$0xff]  ;;  %s3208_s3 = sld [smem:[#allocation16_spill]] }
 0x7ef   : > { %1887 = vmatpush.msrb.mxu2 %v1870_v42 }
 0x7f1   : > { %1888 = vmatpush.msrb.mxu2 %v1869_v44 }
 0x7f3   : > { %1889 = vmatpush.msrb.mxu2 %v1868_v48 }
 0x7f5   : > { %1890 = vmatpush.msrb.mxu2 %v1867_v51  ;;  %v2128_v51 = vld [vmem:[%s3207_s1 + $0x18] sm:$0xff] }
 0x869   : > { %v1695_v6 = vpop.f32.mrf.mxu2 }
 0x86a   : > { %v1698_v7 = vmul.f32 0.17677669, %v1695_v6 }
 0x86c   : > { %v1699_v8 = vsel %vm1238_vm9, %v1698_v7, -inf }
 0x86d   : > { %1700 = vmax.xlane.f32.xlu2 %v1699_v8 }
 0x8e0   : > { %v1701_v9 = vpop.xlane.xlu2 %1700 }
 0x8e1   : > { %v1702_v11 = vsub.f32 %v1698_v7, %v1701_v9 }
 0x8e3   : > { %v1703_v12 = vmul.f32 1.442695, %v1702_v11 }
 0x8e5   : > { %2547 = vpow2.f32 %v1703_v12 }
 0x8eb   : > { %v2548_v13 = vpop.eup %2547 }
 0x8ec   : > { %v1705_v14 = vsel %vm1238_vm9, %v2548_v13, 0.0 }
 0x8ed   : > { %1706 = vadd.xlane.f32.xlu0 %v1705_v14 }
 0x960   : > { %v1707_v15 = vpop.xlane.xlu0 %1706 }
 0x961   : > { %2549 = vrcp.f32 %v1707_v15 }
 0x967   : > { %v2550_v18 = vpop.eup %2549 }
 0x968   : > { %v1709_v19 = vmul.f32 %v2550_v18, %v1707_v15 }
 0x96a   : > { %v1710_v20 = vsub.f32 2.0, %v1709_v19 }
 0x96c   : > { %v1711_v21 = vmul.f32 %v2550_v18, %v1710_v20 }
 0x96e   : > { %v1712_v17 = vmul.f32 %v2548_v13, %v1711_v21 }
 0x970   : > { %2401 = vmatmul.msk.f32.vlgmr.msrb.gmra.mxu3 %vm1238_vm9, %v1712_v17 }
 0x971   : > { %1907 = vmatpush.msrb.mxu3 %v1874_v43 }
 0x973   : > { %1908 = vmatpush.msrb.mxu3 %v1873_v45 }
 0x975   : > { %1909 = vmatpush.msrb.mxu3 %v1872_v49 }
 0x977   : > { %1910 = vmatpush.msrb.mxu3 %v1871_v52  ;;  %v2127_v52 = vld [vmem:[%s3207_s1 + $0x10] sm:$0xff] }
 0x9f3   : > { %v3040_v22 = vpop.f32.mrf.mxu3 }
 0x9f4   : > { %v1738_v24 = vsel %vm933_vm0, %v3040_v22, 0.0 }
 0x9f5   : > { %1739 = vadd.xlane.f32.xlu1 %v1738_v24 }
 0xa68   : > { %v1740_v26 = vpop.xlane.xlu1 %1739 }
 0xa69   : > { %v1741_v16 = vmul.f32 %v1740_v26, %v2883_v10 }
 0xa6b   : > { %v3046_v27 = vsub.f32 %v3040_v22, %v1741_v16 }
 0xa6d   : > { %v1743_v29 = vmul.f32 %v3046_v27, %v3046_v27 }
 0xa6f   : > { %v1744_v30 = vsel %vm933_vm0, %v1743_v29, 0.0 }
 0xa70   : > { %1745 = vadd.xlane.f32.xlu2 %v1744_v30 }
 0xae3   : > { %v1746_v46 = vpop.xlane.xlu2 %1745 }
 0xae4   : > { %v1747_v47 = vmul.f32 %v1746_v46, %v2883_v10 }
 0xae6   : > { %v1748_v50 = vadd.f32 1e-05, %v1747_v47 }
 0xae8   : > { %2551 = vrsqrt.f32 %v1748_v50  ;;  %vm1755_vm12 = vweird.f32 %v1748_v50 }
 0xaee   : > { %v2552_v53 = vpop.eup %2551 }
 0xaef   : > { %v1750_v54 = vmul.f32 %v2552_v53, %v1748_v50  ;;  %vm1756_vm9 = vweird.f32 %v2552_v53 }
 0xaf0   : > { %vm1757_vm13 = vmor %vm1755_vm12, %vm1756_vm9 }
 0xaf1   : > { %v1751_v55 = vmul.f32 %v2552_v53, %v1750_v54 }
 0xaf3   : > { %v1752_v56 = vmul.f32 0.5, %v1751_v55 }
 0xaf5   : > { %v1753_v57 = vsub.f32 1.5, %v1752_v56 }
 0xaf7   : > { %v1754_v58 = vmul.f32 %v2552_v53, %v1753_v57 }
 0xaf9   : > { %v1758_v60 = vsel %vm1757_vm13, %v2552_v53, %v1754_v58  ;;  %v2126_v53 = vld [vmem:[%s3207_s1 + $0x8] sm:$0xff] }
 0xafa   : > { %v1759_v62 = vmul.f32 %v1758_v60, %v3046_v27 }
 0xafc   : > { %v1763_v63 = vmul.f32 %v2501_v59, %v1759_v62 }
 0xafe   : > { %v1767_v1 = vadd.f32 %v2502_v61, %v1763_v63  ;;  %v2503_v63 = vld [vmem:[%s3208_s3] ss:$0 sm:$0xff] }
 0xb00   : > { %2402 = vmatmul.msk.f32.vlgmr.msra.gmra.mxu2 %vm933_vm0, %v1767_v1  ;;  %2403 = vmatmul.msk.f32.vlgmr.msra.gmra.mxu3 %vm933_vm0, %v1767_v1 }
 0xb01   : > { %2404 = vmatmul.msk.f32.vlgmr.msra.gmra.mxu0 %vm933_vm0, %v1767_v1  ;;  %2405 = vmatmul.msk.f32.vlgmr.msra.gmra.mxu1 %vm933_vm0, %v1767_v1 }
 0xb08   : > { %2406 = vmatmul.msk.f32.vlgmr.msrb.gmra.mxu2 %vm933_vm0, %v1767_v1  ;;  %2407 = vmatmul.msk.f32.vlgmr.msrb.gmra.mxu3 %vm933_vm0, %v1767_v1 }
 0xb7e   : > { %v1844_v3 = vpop.f32.mrf.mxu0  ;;  %v1864_v4 = vpop.f32.mrf.mxu1 }
 0xb7f   : > { %2408 = vmatpush.xpose.msk.msrb.mxu0 %vm1163_vm8, %v1844_v3  ;;  %2410 = vmatpush.xpose.msk.msrb.mxu1 %vm1163_vm8, %v1864_v4  ;;  %v2504_v4 = vld [vmem:[%s3209_s4] ss:$0 sm:$0xff]  ;;  %s921_s4 = sand.u32 1, %s2623_s16  }
 0xb80   : > { %s2363_s3 = sshll.u32 %s921_s4, 3 }
 0xb83   : > { %v1796_v5 = vpop.f32.mrf.mxu2  ;;  %v1816_v6 = vpop.f32.mrf.mxu3  ;;  %2063 = vmatpush.msra.mxu0 %v2043_v39  ;;  %2086 = vmatpush.msra.mxu1 %v2044_v2 }
 0xb84   : > { %2409 = vmatmul.msk.f32.vlgmr.msrb.gmra.mxu0 %vm1163_vm8, %v1796_v5  ;;  %2411 = vmatmul.msk.f32.vlgmr.msrb.gmra.mxu1 %vm1163_vm8, %v1816_v6 }
 0xb8b   : > { %v1892_v7 = vpop.f32.mrf.mxu2  ;;  %v1912_v8 = vpop.f32.mrf.mxu3 }
 0xb8c   : > { %2015 = vmatpush.msra.mxu2 %v1892_v7  ;;  %2038 = vmatpush.msra.mxu3 %v1912_v8  ;;  %v2505_v7 = vld [vmem:[%s3210_s5] ss:$0 sm:$0xff]  ;;  %s3212_s5 = sld [smem:[#allocation21_spill]] }
 0xb8e   : > { %2148 = vmatpush.msrb.mxu2 %v2128_v51 }
 0xb90   : > { %2149 = vmatpush.msrb.mxu2 %v2127_v52 }
 0xb92   : > { %2150 = vmatpush.msrb.mxu2 %v2126_v53 }
 0xc01   : > { %v1938_v9 = vpop.f32.mrf.mxu0  ;;  %v1964_v11 = vpop.f32.mrf.mxu1 }
 0xc02   : > { %v1967_v12 = vmul.f32 0.35355338, %v1938_v9  ;;  %v1968_v13 = vmul.f32 0.35355338, %v1964_v11 }
 0xc04   : > { %v1972_v14 = vsel %vm1163_vm8, %v1968_v13, -inf  ;;  %v1969_v15 = vsel %vm1163_vm8, %v1967_v12, -inf }
 0xc05   : > { %1973 = vmax.xlane.f32.xlu1 %v1972_v14  ;;  %1970 = vmax.xlane.f32.xlu0 %v1969_v15  ;;  %v2191_v15 = vld [vmem:[%s3211_s6 + $0x30] sm:$0xff] }
 0xc78   : > { %v1974_v18 = vpop.xlane.xlu1 %1973  ;;  %v1971_v19 = vpop.xlane.xlu0 %1970 }
 0xc79   : > { %v1976_v20 = vsub.f32 %v1968_v13, %v1974_v18  ;;  %v1975_v21 = vsub.f32 %v1967_v12, %v1971_v19  ;;  %v2192_v13 = vld [vmem:[%s3211_s6 + $0x38] sm:$0xff]  ;;  %v2190_v19 = vld [vmem:[%s3211_s6 + $0x28] sm:$0xff] }
 0xc7a   : > { %2208 = vmatpush.msrb.mxu3 %v2192_v13 }
 0xc7b   : > { %v1979_v17 = vmul.f32 1.442695, %v1976_v20  ;;  %v1977_v24 = vmul.f32 1.442695, %v1975_v21  ;;  %v2189_v20 = vld [vmem:[%s3211_s6 + $0x20] sm:$0xff]  ;;  %v2188_v21 = vld [vmem:[%s3211_s6 + $0x18] sm:$0xff] }
 0xc7c   : > { %2209 = vmatpush.msrb.mxu3 %v2191_v15 }
 0xc7d   : > { %2553 = vpow2.f32 %v1979_v17  ;;  %v2187_v17 = vld [vmem:[%s3211_s6 + $0x10] sm:$0xff] }
 0xc7e   : > { %2555 = vpow2.f32 %v1977_v24  ;;  %2210 = vmatpush.msrb.mxu3 %v2190_v19 }
 0xc80   : > { %2211 = vmatpush.msrb.mxu3 %v2189_v20 }
 0xc82   : > { %2212 = vmatpush.msrb.mxu3 %v2188_v21 }
 0xc83   : > { %v2554_v26 = vpop.eup %2553 }
 0xc84   : > { %v2556_v16 = vpop.eup %2555  ;;  %v1984_v27 = vsel %vm1163_vm8, %v2554_v26, 0.0  ;;  %2213 = vmatpush.msrb.mxu3 %v2187_v17 }
 0xc85   : > { %1985 = vadd.xlane.f32.xlu0 %v1984_v27  ;;  %v1981_v29 = vsel %vm1163_vm8, %v2556_v16, 0.0  ;;  %v2185_v27 = vld [vmem:[%s3211_s6] sm:$0xff] }
 0xc86   : > { %1982 = vadd.xlane.f32.xlu2 %v1981_v29 }
 0xcf8   : > { %v1986_v30 = vpop.xlane.xlu0 %1985 }
 0xcf9   : > { %v1983_v31 = vpop.xlane.xlu2 %1982  ;;  %2557 = vrcp.f32 %v1986_v30 }
 0xcfa   : > { %2559 = vrcp.f32 %v1983_v31 }
 0xcff   : > { %v2558_v32 = vpop.eup %2557 }
 0xd00   : > { %v2560_v25 = vpop.eup %2559  ;;  %v1990_v23 = vmul.f32 %v2558_v32, %v1986_v30 }
 0xd01   : > { %v1989_v34 = vmul.f32 %v2560_v25, %v1983_v31 }
 0xd02   : > { %v1992_v35 = vsub.f32 2.0, %v1990_v23 }
 0xd03   : > { %v1991_v0 = vsub.f32 2.0, %v1989_v34 }
 0xd04   : > { %v1994_v36 = vmul.f32 %v2558_v32, %v1992_v35 }
 0xd05   : > { %v1993_v37 = vmul.f32 %v2560_v25, %v1991_v0 }
 0xd06   : > { %v1996_v28 = vmul.f32 %v2554_v26, %v1994_v36 }
 0xd07   : > { %v1995_v38 = vmul.f32 %v2556_v16, %v1993_v37  ;;  %v2186_v16 = vld [vmem:[%s3211_s6 + $0x8] sm:$0xff]  ;;  %s923_s6 = scalar_lea.vmem [#allocation2], %s2363_s3 }
 0xd08   : > { %2413 = vmatmul.msk.f32.vlgmr.msra.gmra.mxu3 %vm1163_vm8, %v1996_v28  ;;  %s2267_s8 = sshll.u32 %s923_s6, 4  ;;  %s2268_s8 = int_to_ptr.vmem [resolvable:$true] %s2267_s8 }
 0xd09   : > { %2412 = vmatmul.msk.f32.vlgmr.msra.gmra.mxu2 %vm1163_vm8, %v1995_v38  ;;  %2214 = vmatpush.msrb.mxu3 %v2186_v16 }
 0xd0b   : > { %2215 = vmatpush.msrb.mxu3 %v2185_v27 }
 0xd8b   : > { %v2040_v33 = vpop.f32.mrf.mxu3 }
 0xd8c   : > { %v2017_v40 = vpop.f32.mrf.mxu2  ;;  %2415 = vmatmul.msk.f32.vlgmr.msra.gmra.mxu1 %vm1163_vm8, %v2040_v33 }
 0xd8d   : > { %2414 = vmatmul.msk.f32.vlgmr.msra.gmra.mxu0 %vm1163_vm8, %v2017_v40 }
 0xe09   : > { %v2088_v41 = vpop.f32.mrf.mxu1 }
 0xe0a   : > { %v2065_v42 = vpop.f32.mrf.mxu0 }
 0xe0b   : > { %v2091_v43 = vadd.f32 %v2088_v41, %v2065_v42 }
 0xe0d   : > { %v3100_v44 = vadd.f32 %v2091_v43, %v3040_v22  ;;  %v2125_v22 = vld [vmem:[%s3207_s1] sm:$0xff] }
 0xe0e   : > { %2151 = vmatpush.msrb.mxu2 %v2125_v22 }
 0xe0f   : > { %v2095_v45 = vsel %vm933_vm0, %v3100_v44, 0.0 }
 0xe10   : > { %2096 = vadd.xlane.f32.xlu1 %v2095_v45 }
 0xe83   : > { %v2097_v46 = vpop.xlane.xlu1 %2096 }
 0xe84   : > { %v2098_v47 = vmul.f32 %v2097_v46, %v2883_v10 }
 0xe86   : > { %v2099_v48 = vsub.f32 %v3100_v44, %v2098_v47  ;;  %v2506_v47 = vld [vmem:[%s3212_s5] ss:$0 sm:$0xff]  ;;  %s2419_s5 = sshll.u32 %s2845_s0, 3  ;;  %s2255_s0 = scalar_lea.sflag [#allocation3], %s921_s4 }
 0xe87   : > { %s2265_s1 = scalar_lea.hbm %s2822_s12, %s2419_s5  ;;  %s2589_s5 = scalar_lea.hbm %s2822_s12, 16 }
 0xe88   : > { %v2100_v49 = vmul.f32 %v2099_v48, %v2099_v48  ;;  %s2269_s9 = sshll.u32 %s2265_s1, 4  ;;  %s2270_s9 = int_to_ptr.hbm [resolvable:$true] %s2269_s9 }
 0xe89   : > { %s2583_s11 = sshra.s32 %s2270_s9, 4  ;;  %s2584_s11 = int_to_ptr.hbm [resolvable:$true] %s2583_s11 }
 0xe8a   : > { %v2101_v50 = vsel %vm933_vm0, %v2100_v49, 0.0  ;;  %s2585_s13 = scalar_lea.hbm %s2584_s11, 8  ;;  %p2590_p0 = scmp.lt.s32.totalorder %s2584_s11, %s2822_s12 }
 0xe8b   : > { %2102 = vadd.xlane.f32.xlu2 %v2101_v50  ;;  %p2586_p11 = scmp.ne.s32.totalorder %s2584_s11, %s2585_s13  ;;  %p2591_p1 = scmp.lt.s32.totalorder %s2589_s5, %s2585_s13 }
 0xe8d   : > { %p2587_p12 = pnand %p2586_p11, %p2862_p5  ;;  %p2592_p2 = por %p2591_p1, %p2590_p0 }
 0xe8f   : > { %p2588_p13 = pneg %p2587_p12 }
 0xe91   : > { %p2593_p3 = pnand %p2592_p2, %p2588_p13 }
 0xefe   : > { %v2103_v54 = vpop.xlane.xlu2 %2102 }
 0xeff   : > { %v2104_v55 = vmul.f32 %v2103_v54, %v2883_v10 }
 0xf01   : > { %v2105_v56 = vadd.f32 1e-05, %v2104_v55 }
 0xf03   : > { %2561 = vrsqrt.f32 %v2105_v56  ;;  %vm2112_vm14 = vweird.f32 %v2105_v56 }
 0xf09   : > { %v2562_v57 = vpop.eup %2561 }
 0xf0a   : > { %v2107_v58 = vmul.f32 %v2562_v57, %v2105_v56  ;;  %vm2113_vm8 = vweird.f32 %v2562_v57 }
 0xf0b   : > { %vm2114_vm15 = vmor %vm2112_vm14, %vm2113_vm8 }
 0xf0c   : > { %v2108_v59 = vmul.f32 %v2562_v57, %v2107_v58 }
 0xf0e   : > { %v2109_v60 = vmul.f32 0.5, %v2108_v59 }
 0xf10   : > { %v2110_v61 = vsub.f32 1.5, %v2109_v60 }
 0xf12   : > { %v2111_v62 = vmul.f32 %v2562_v57, %v2110_v61 }
 0xf14   : > { %v2115_v1 = vsel %vm2114_vm15, %v2562_v57, %v2111_v62 }
 0xf15   : > { %v2116_v3 = vmul.f32 %v2115_v1, %v2099_v48  ;;  %v2507_v1 = vld [vmem:[%s2812_s27] ss:$0 sm:$0xff] }
 0xf17   : > { %v2120_v5 = vmul.f32 %v2503_v63, %v2116_v3 }
 0xf19   : > { %v2124_v6 = vadd.f32 %v2504_v4, %v2120_v5  ;;  %v2508_v4 = vld [vmem:[%s2817_s20] ss:$0 sm:$0xff] }
 0xf1b   : > { %2416 = vmatmul.msk.f32.vlgmr.msrb.gmra.mxu2 %vm933_vm0, %v2124_v6 }
 0xf9e   : > { %v2153_v8 = vpop.f32.mrf.mxu2 }
 0xf9f   : > { %v2154_v9 = vadd.f32 %v2505_v7, %v2153_v8 }
 0xfa1   : > { %v2157_v11 = vmul.f32 0.70710677, %v2154_v9  ;;  %v2156_v43 = vmul.f32 0.5, %v2154_v9 }
 0xfa3   : > { %v2158_v12 = vand.u32 2147483647, %v2157_v11  ;;  %vm2180_vm1 = vcmp.ge.f32.partialorder %v2157_v11, 0.0 }
 0xfa5   : > { %v2159_v14 = vmul.f32 0.3275911, %v2158_v12  ;;  %v2174_v31 = vsub.f32 0.0, %v2158_v12 }
 0xfa7   : > { %v2160_v18 = vadd.f32 1.0, %v2159_v14  ;;  %v2175_v23 = vmul.f32 %v2174_v31, %v2158_v12 }
 0xfa9   : > { %2563 = vrcp.f32 %v2160_v18  ;;  %v2176_v0 = vmul.f32 1.442695, %v2175_v23 }
 0xfab   : > { %2565 = vpow2.f32 %v2176_v0 }
 0xfaf   : > { %v2564_v24 = vpop.eup %2563 }
 0xfb0   : > { %v2162_v26 = vmul.f32 %v2564_v24, %v2160_v18 }
 0xfb1   : > { %v2566_v2 = vpop.eup %2565 }
 0xfb2   : > { %v2163_v29 = vsub.f32 2.0, %v2162_v26 }
 0xfb4   : > { %v2164_v30 = vmul.f32 %v2564_v24, %v2163_v29 }
 0xfb6   : > { %v2165_v32 = vmul.f32 1.0614054, %v2164_v30 }
 0xfb8   : > { %v2166_v25 = vadd.f32 -1.4531521, %v2165_v32 }
 0xfba   : > { %v2167_v34 = vmul.f32 %v2166_v25, %v2164_v30 }
 0xfbc   : > { %v2168_v35 = vadd.f32 1.4214138, %v2167_v34 }
 0xfbe   : > { %v2169_v36 = vmul.f32 %v2168_v35, %v2164_v30 }
 0xfc0   : > { %v2170_v37 = vadd.f32 -0.28449672, %v2169_v36 }
 0xfc2   : > { %v2171_v28 = vmul.f32 %v2170_v37, %v2164_v30 }
 0xfc4   : > { %v2172_v38 = vadd.f32 0.2548296, %v2171_v28 }
 0xfc6   : > { %v2173_v39 = vmul.f32 %v2172_v38, %v2164_v30 }
 0xfc8   : > { %v2178_v33 = vmul.f32 %v2566_v2, %v2173_v39 }
 0xfca   : > { %v2179_v40 = vsub.f32 1.0, %v2178_v33 }
 0xfcc   : > { %v2181_v41 = vsub.f32 0.0, %v2179_v40 }
 0xfce   : > { %v2182_v42 = vsel %vm2180_vm1, %v2179_v40, %v2181_v41 }
 0xfcf   : > { %v2183_v45 = vadd.f32 1.0, %v2182_v42 }
 0xfd1   : > { %v2184_v46 = vmul.f32 %v2183_v45, %v2156_v43 }
 0xfd3   : > { %2417 = vmatmul.msk.f32.vlgmr.msrb.gmra.mxu3 %vm1580_vm2, %v2184_v46 }
0x1056   : > { %v2217_v48 = vpop.f32.mrf.mxu3 }
0x1057   : > { %v2218_v49 = vadd.f32 %v2506_v47, %v2217_v48 }
0x1059   : > { %v2220_v50 = vadd.f32 %v2218_v49, %v3100_v44 }
0x105b   : > { %v2223_v51 = vsel %vm933_vm0, %v2220_v50, 0.0 }
0x105c   : > { %2224 = vadd.xlane.f32.xlu0 %v2223_v51 }
0x10cf   : > { %v2225_v52 = vpop.xlane.xlu0 %2224 }
0x10d0   : > { %v2226_v53 = vmul.f32 %v2225_v52, %v2883_v10 }
0x10d2   : > { %v2227_v22 = vsub.f32 %v2220_v50, %v2226_v53 }
0x10d4   : > { %v2228_v54 = vmul.f32 %v2227_v22, %v2227_v22 }
0x10d6   : > { %v2229_v55 = vsel %vm933_vm0, %v2228_v54, 0.0 }
0x10d7   : > { %2230 = vadd.xlane.f32.xlu1 %v2229_v55 }
0x114a   : > { %v2231_v56 = vpop.xlane.xlu1 %2230 }
0x114b   : > { %v2232_v57 = vmul.f32 %v2231_v56, %v2883_v10 }
0x114d   : > { %v2233_v58 = vadd.f32 1e-05, %v2232_v57 }
0x114f   : > { %2567 = vrsqrt.f32 %v2233_v58  ;;  %vm2240_vm3 = vweird.f32 %v2233_v58 }
0x1155   : > { %v2568_v44 = vpop.eup %2567 }
0x1156   : > { %v2235_v59 = vmul.f32 %v2568_v44, %v2233_v58  ;;  %vm2241_vm2 = vweird.f32 %v2568_v44 }
0x1157   : > { %vm2242_vm4 = vmor %vm2240_vm3, %vm2241_vm2 }
0x1158   : > { %v2236_v60 = vmul.f32 %v2568_v44, %v2235_v59 }
0x115a   : > { %v2237_v61 = vmul.f32 0.5, %v2236_v60 }
0x115c   : > { %v2238_v62 = vsub.f32 1.5, %v2237_v61 }
0x115e   : > { %v2239_v63 = vmul.f32 %v2568_v44, %v2238_v62 }
0x1160   : > { %v2243_v3 = vsel %vm2242_vm4, %v2568_v44, %v2239_v63 }
0x1161   : > { %v2244_v10 = vmul.f32 %v2243_v3, %v2227_v22 }
0x1163   : > { %v2248_v5 = vmul.f32 %v2507_v1, %v2244_v10 }
0x1165   : > { %v2252_v6 = vadd.f32 %v2508_v4, %v2248_v5 }
0x1167   : > { %2253 = vst.msk [vmem:[%s923_s6] sm:$0xff] %vm933_vm0, %v2252_v6 }
0x1168   : > { %2596 = shalt.err (!%p2593_p3)
}
0x1169   : > { %2423 = dma.vmem_to_hbm [thread:$0]  (%p2862_p5), %s2268_s8, 128, %s2270_s9, %s2255_s0  }
0x116a PF: > { %p2429_p4 = scmp.ge.s32.totalorder %s2631_s22, 2  ;;  %s2281_s6 = sand.u32 1, %s2619_s15  }
0x116b   : > { %s2282_s1 = scalar_lea.sflag [#allocation3], %s2281_s6 }
0x116c   : > { %p2426_p7 = pnand %p2429_p4, %p2866_p6 }
0x116e   : > { %p2427_p8 = pneg %p2426_p7 }
0x1170   : > { %2614 = dma.done.wait (%p2427_p8), %s2282_s1, 128  }
0x1171   : > { %2616 = vsyncadd (%p2427_p8), %s2282_s1, 4294967168  ;;  %p71_p9 = scmp.ge.s32.totalorder %s2849_s26, 4   ;;  %s3213_s15 = smov %s2623_s16 }
0x1172   : > { %s3214_s16 = smov %s2627_s18  ;;  %s3215_s18 = smov %s2860_s2 }
0x1173   : > { %s3216_s22 = smov %s2849_s26  ;;  %73 = sbr.rel (!%p71_p9) target bundleno = 62 (0x3e), region = 205 }
0x1178   :  { %2288 = vsyncpa [#allocation3], 1 }
0x1179   :  { %2290 = vsyncpa [#allocation3 + $0x1], 1 }

</bundles_post_ra>
